<compile_context>
chip_gen: v7x
topology: tpu7x:2x2x1
jax: 0.10.0
libtpu: 0.0.40
codegen_flags: <defaults>
</compile_context>

<pallas_src>
import math
import jax
import jax.numpy as jnp
from jax.experimental import pallas as pl
from jax.experimental.pallas import tpu as pltpu

# ----- static problem configuration (consistent with the module __init__) -----
B, S, D = 2, 16, 64          # batch, sequence, model dim
HQ, HKV = 4, 2               # n_heads, n_kv_heads (GQA)
HD = D // HQ                 # head_dim = 16
NREP = HQ // HKV             # kv replication factor
DC = min(D, 1024)            # adaLN input dim
MULTIPLE_OF = 32
FFN_MULT = 1.0
FFN = MULTIPLE_OF * ((int(FFN_MULT * 4 * D) + MULTIPLE_OF - 1) // MULTIPLE_OF)  # 256
NORM_EPS = 1e-5              # block RMSNorm eps
QK_EPS = 1e-6                # q/k RMSNorm eps (PyTorch RMSNorm default)
SM_SCALE = 1.0 / math.sqrt(HD)
NEG_INF = -1e30


# ------------------------------ Pallas kernel -----------------------------------
def make_kernel(nb_batches: int):
    """Kernel processing a block of `nb_batches` batches as (nb_batches*S, D) rows."""

    def kernel(x_ref, mask_ref, cos_ref, sin_ref,
               smsa_ref, gmsa_ref, smlp_ref, gmlp_ref,
               wqkv_ref, wout_ref, w13_ref, w2_ref, gsum_ref, rotq_ref,
               an1_ref, an2_ref, fn1_ref, fn2_ref, qn_ref, kn_ref,
               o_ref):
        f32 = jnp.float32
        bf16 = jnp.bfloat16

        def rms(v, w, eps):
            ms = jnp.mean(v * v, axis=-1, keepdims=True)
            return v * jax.lax.rsqrt(ms + eps) * w

        def bdot(a, b):
            # bf16 MXU matmul with f32 accumulation (weights already bf16).
            return jnp.dot(a.astype(bf16), b.astype(bf16),
                           preferred_element_type=f32)

        x = x_ref[...]                                           # (R, D) f32

        # ---- attention branch: modulated RMSNorm + fused QKV projection ----
        h = rms(x, an1_ref[...], NORM_EPS) * (1.0 + smsa_ref[...])
        qkv = bdot(h, wqkv_ref[...])                             # (R, (HQ+2HKV)*HD)
        q_all = qkv[:, :HQ * HD]                                 # (R, 64)
        k_all = qkv[:, HQ * HD:(HQ + HKV) * HD]                  # (R, 32)
        v_all = qkv[:, (HQ + HKV) * HD:]                         # (R, 32)

        # per-head RMSNorm for q/k in one shot: gsum has 1/HD inside each
        # head's HD x HD block, so (t*t) @ gsum puts every head's
        # mean-of-squares on each of that head's lanes (f32 for precision).
        gsum = gsum_ref[...]                                     # (64, 64) f32
        msq_q = jnp.dot(q_all * q_all, gsum, preferred_element_type=f32)
        q_n = q_all * jax.lax.rsqrt(msq_q + QK_EPS) * qn_ref[...]
        gsum_k = gsum[:HKV * HD, :HKV * HD]
        msq_k = jnp.dot(k_all * k_all, gsum_k, preferred_element_type=f32)
        k_n = k_all * jax.lax.rsqrt(msq_k + QK_EPS) * kn_ref[...]

        # RoPE for all heads at once: block-diagonal pair-swap matrix maps
        # (x0, x1) -> (-x1, x0) per pair, so out = t*cos + (t @ rot)*sin.
        cos_q = cos_ref[...]                                     # (R, 64) head-tiled
        sin_q = sin_ref[...]
        rotq = rotq_ref[...]                                     # (64, 64) bf16
        q_r = q_n * cos_q + bdot(q_n, rotq) * sin_q
        k_r = (k_n * cos_q[:, :HKV * HD]
               + bdot(k_n, rotq[:HKV * HD, :HKV * HD]) * sin_q[:, :HKV * HD])

        bias_all = jnp.where(mask_ref[...] > 0.0, 0.0, NEG_INF)  # (NB, 1, S)
        wout = wout_ref[...]                                     # (HQ*HD, D) bf16

        # ---- GQA attention: per (batch, kv-group) the NREP query heads are
        #      stacked along sublanes -> one score + one PV matmul per group;
        #      the output projection is accumulated per head (no concat). ----
        attn_parts = []
        for nb in range(nb_batches):
            r0 = nb * S
            qb = q_r[r0:r0 + S, :]
            kb = k_r[r0:r0 + S, :]
            vb = v_all[r0:r0 + S, :]
            bias = bias_all[nb]                                  # (1, S)
            attn_b = jnp.zeros((S, D), f32)
            for g in range(HKV):
                h0 = g * NREP
                q_grp = jnp.concatenate(
                    [qb[:, (h0 + j) * HD:(h0 + j + 1) * HD] for j in range(NREP)],
                    axis=0)                                      # (NREP*S, HD)
                k_g = kb[:, g * HD:(g + 1) * HD]                 # (S, HD)
                v_g = vb[:, g * HD:(g + 1) * HD]                 # (S, HD)
                s = jax.lax.dot_general(q_grp, k_g,
                                        (((1,), (1,)), ((), ())),
                                        preferred_element_type=f32)  # (NREP*S, S)
                s = s * SM_SCALE + bias
                m = jnp.max(s, axis=-1, keepdims=True)
                p = jnp.exp(s - m)
                p = p * pl.reciprocal(jnp.sum(p, axis=-1, keepdims=True),
                                      approx=True)
                o_grp = jnp.dot(p, v_g, preferred_element_type=f32)  # (NREP*S, HD)
                for j in range(NREP):
                    hh = h0 + j
                    attn_b = attn_b + bdot(o_grp[j * S:(j + 1) * S, :],
                                           wout[hh * HD:(hh + 1) * HD, :])
            attn_parts.append(attn_b)
        attn = (attn_parts[0] if nb_batches == 1
                else jnp.concatenate(attn_parts, axis=0))        # (R, D)

        x1 = x + gmsa_ref[...] * rms(attn, an2_ref[...], NORM_EPS)

        # ---- feed-forward (SwiGLU) with fused w1/w3 ----
        h2 = rms(x1, fn1_ref[...], NORM_EPS) * (1.0 + smlp_ref[...])
        gu = bdot(h2, w13_ref[...])                              # (R, 2*FFN)
        gate = gu[:, :FFN]
        up = gu[:, FFN:]
        ff = bdot(gate * jax.nn.sigmoid(gate) * up, w2_ref[...])
        o_ref[...] = x1 + gmlp_ref[...] * rms(ff, fn2_ref[...], NORM_EPS)

    return kernel


# ------------------------------ wrapper ------------------------------------------
def _nb_per_block():
    """Batches fused per kernel block: keep a parallel batch axis on v7x
    (2 TensorCores/chip); fuse all batches into one block on v5e/v6e."""
    try:
        kind = jax.devices()[0].device_kind.lower()
    except Exception:
        kind = ""
    return 1 if ("v7" in kind or "7x" in kind) else B


def joint_transformer_block(x, x_mask, cos_half, sin_half, adaln, params):
    nb = _nb_per_block()
    grid = (B // nb,)
    rows = nb * S

    # ---- adaLN modulation hoisted out of the kernel (plain XLA) ----
    mod = jax.nn.silu(adaln.astype(jnp.float32)) @ params["wada"] + params["bada"]
    scale_msa, gate_msa, scale_mlp, gate_mlp = jnp.split(mod, 4, axis=-1)

    def per_row(v):                                   # (B, D) -> (B*S, D)
        return jnp.broadcast_to(v[:, None, :], (B, S, D)).reshape(B * S, D)

    smsa, smlp = per_row(scale_msa), per_row(scale_mlp)
    gmsa, gmlp = per_row(jnp.tanh(gate_msa)), per_row(jnp.tanh(gate_mlp))

    # ---- RoPE tables: interleave-tiled over head dim, tiled across heads ----
    cos_full = jnp.repeat(cos_half, 2, axis=-1)                     # (B, S, HD)
    sin_full = jnp.repeat(sin_half, 2, axis=-1)
    cos_q = jnp.tile(cos_full, (1, 1, HQ)).reshape(B * S, HQ * HD).astype(jnp.float32)
    sin_q = jnp.tile(sin_full, (1, 1, HQ)).reshape(B * S, HQ * HD).astype(jnp.float32)

    mask3 = x_mask.reshape(B, 1, S).astype(jnp.float32)

    # ---- kernel-side weights: fused / tiled / cast to bf16 for the MXU ----
    wqkv_bf = params["wqkv"].astype(jnp.bfloat16)
    wout_bf = params["wout"].astype(jnp.bfloat16)
    w13_bf = jnp.concatenate([params["w1"], params["w3"]], axis=1).astype(jnp.bfloat16)
    w2_bf = params["w2"].astype(jnp.bfloat16)

    # per-head mean-of-squares block matrix (f32, precision-sensitive)
    gsum = (jnp.kron(jnp.eye(HQ, dtype=jnp.float32),
                     jnp.ones((HD, HD), jnp.float32)) / HD)          # (64, 64)
    # block-diagonal interleaved pair-swap matrix: (x0, x1) -> (-x1, x0)
    eye_p = jnp.eye(HD // 2, dtype=jnp.float32)
    rot_hd = jnp.zeros((HD, HD), jnp.float32)
    rot_hd = rot_hd.at[1::2, 0::2].set(-eye_p)
    rot_hd = rot_hd.at[0::2, 1::2].set(eye_p)
    rotq_bf = jnp.kron(jnp.eye(HQ, dtype=jnp.float32), rot_hd).astype(jnp.bfloat16)

    qn_t = jnp.tile(params["qn"], (1, HQ))             # (1, HQ*HD)
    kn_t = jnp.tile(params["kn"], (1, HKV))            # (1, HKV*HD)

    weights = (wqkv_bf, wout_bf, w13_bf, w2_bf, gsum, rotq_bf,
               params["an1"], params["an2"], params["fn1"], params["fn2"],
               qn_t, kn_t)

    def rows_spec(ncols):
        return pl.BlockSpec((rows, ncols), lambda b: (b, 0))

    in_specs = [
        rows_spec(D),                                        # x rows
        pl.BlockSpec((nb, 1, S), lambda b: (b, 0, 0)),       # key-padding mask
        rows_spec(HQ * HD), rows_spec(HQ * HD),              # cos, sin
        rows_spec(D), rows_spec(D), rows_spec(D), rows_spec(D),  # modulation rows
    ] + [pl.BlockSpec(w.shape, lambda b: (0, 0)) for w in weights]

    out = pl.pallas_call(
        make_kernel(nb),
        out_shape=jax.ShapeDtypeStruct((B * S, D), jnp.float32),
        grid_spec=pltpu.PrefetchScalarGridSpec(
            num_scalar_prefetch=0,
            grid=grid,
            in_specs=in_specs,
            out_specs=rows_spec(D),
        ),
        compiler_params=pltpu.CompilerParams(
            dimension_semantics=("parallel",)),
    )(x.astype(jnp.float32).reshape(B * S, D), mask3, cos_q, sin_q,
      smsa, gmsa, smlp, gmlp, *weights)

    return out.reshape(B, S, D)


# ------------------------------ parameter init -----------------------------------
def xavier(key, shape):
    bound = math.sqrt(6.0 / (shape[0] + shape[1]))
    return jax.random.uniform(key, shape, jnp.float32, -bound, bound)


def make_params(key):
    ks = jax.random.split(key, 8)
    # Weights stored (in_dim, out_dim) so everything computes x @ W.
    return {
        "wqkv": xavier(ks[0], (D, (HQ + 2 * HKV) * HD)),
        "wout": xavier(ks[1], (HQ * HD, D)),
        "w1": xavier(ks[2], (D, FFN)),
        "w3": xavier(ks[3], (D, FFN)),
        "w2": xavier(ks[4], (FFN, D)),
        # PyTorch inits adaLN weight/bias to zeros (block would be identity);
        # use small random values so the whole path is exercised.
        "wada": 0.05 * jax.random.normal(ks[5], (DC, 4 * D), jnp.float32),
        "bada": 0.05 * jax.random.normal(ks[6], (1, 4 * D), jnp.float32),
        "an1": jnp.ones((1, D), jnp.float32),
        "fn1": jnp.ones((1, D), jnp.float32),
        "an2": jnp.ones((1, D), jnp.float32),
        "fn2": jnp.ones((1, D), jnp.float32),
        "qn": jnp.ones((1, HD), jnp.float32),
        "kn": jnp.ones((1, HD), jnp.float32),
    }


# ------------------------------ pure-JAX reference -------------------------------
def reference_forward(x, x_mask, cos_half, sin_half, adaln, p):
    def rms(v, w, eps):
        return v * jax.lax.rsqrt(jnp.mean(v * v, axis=-1, keepdims=True) + eps) * w

    def silu(v):
        return v * jax.nn.sigmoid(v)

    mod = silu(adaln) @ p["wada"] + p["bada"]
    scale_msa, gate_msa, scale_mlp, gate_mlp = jnp.split(mod, 4, axis=-1)

    h = rms(x, p["an1"][0], NORM_EPS) * (1.0 + scale_msa[:, None, :])
    qkv = h @ p["wqkv"]
    q = qkv[..., :HQ * HD].reshape(B, S, HQ, HD)
    k = qkv[..., HQ * HD:(HQ + HKV) * HD].reshape(B, S, HKV, HD)
    v = qkv[..., (HQ + HKV) * HD:].reshape(B, S, HKV, HD)
    q = rms(q, p["qn"][0], QK_EPS)
    k = rms(k, p["kn"][0], QK_EPS)

    def rope(t, H):
        tr = t.reshape(B, S, H, HD // 2, 2)
        t0, t1 = tr[..., 0], tr[..., 1]
        c = cos_half[:, :, None, :]
        s = sin_half[:, :, None, :]
        return jnp.stack([t0 * c - t1 * s, t0 * s + t1 * c], axis=-1).reshape(B, S, H, HD)

    q, k = rope(q, HQ), rope(k, HKV)
    k = jnp.repeat(k, NREP, axis=2)
    v = jnp.repeat(v, NREP, axis=2)
    scores = jnp.einsum("bshd,bthd->bhst", q, k) * SM_SCALE
    bias = jnp.where(x_mask[:, None, None, :] > 0, 0.0, NEG_INF)
    probs = jax.nn.softmax(scores + bias, axis=-1)
    attn = jnp.einsum("bhst,bthd->bshd", probs, v).reshape(B, S, HQ * HD) @ p["wout"]
    x1 = x + jnp.tanh(gate_msa)[:, None, :] * rms(attn, p["an2"][0], NORM_EPS)

    h2 = rms(x1, p["fn1"][0], NORM_EPS) * (1.0 + scale_mlp[:, None, :])
    ff = (silu(h2 @ p["w1"]) * (h2 @ p["w3"])) @ p["w2"]
    return x1 + jnp.tanh(gate_mlp)[:, None, :] * rms(ff, p["fn2"][0], NORM_EPS)


# ------------------------------ main ----------------------------------------------
if __name__ == "__main__":
    key = jax.random.PRNGKey(0)
    k_x, k_a, k_p = jax.random.split(key, 3)

    x = jax.random.normal(k_x, (B, S, D), jnp.float32)
    adaln = jax.random.normal(k_a, (B, DC), jnp.float32)
    # key-padding mask: batch 0 attends everywhere, batch 1 masks last 4 keys
    x_mask = jnp.stack([
        jnp.ones((S,), jnp.float32),
        jnp.concatenate([jnp.ones((S - 4,), jnp.float32), jnp.zeros((4,), jnp.float32)]),
    ], axis=0)

    # rotary frequencies (freqs_cis as cos/sin halves, shape (B, S, HD//2))
    pos = jnp.arange(S, dtype=jnp.float32)
    inv_freq = 1.0 / (10000.0 ** (jnp.arange(0, HD, 2, dtype=jnp.float32) / HD))
    ang = pos[:, None] * inv_freq[None, :]
    cos_half = jnp.broadcast_to(jnp.cos(ang)[None], (B, S, HD // 2))
    sin_half = jnp.broadcast_to(jnp.sin(ang)[None], (B, S, HD // 2))

    params = make_params(k_p)

    out = joint_transformer_block(x, x_mask, cos_half, sin_half, adaln, params)
    out = jax.block_until_ready(out)

    ref = reference_forward(x, x_mask, cos_half, sin_half, adaln, params)
    assert out.shape == (B, S, D)
    assert bool(jnp.all(jnp.isfinite(out)))
    max_err = float(jnp.max(jnp.abs(out - ref)))
    assert max_err < 5e-2, f"mismatch vs reference: max_err={max_err}"

    print("KERNEL_OK")
</pallas_src>

<mosaic_0001>
module attributes {stable_mosaic.version = 11 : i64} {
  func.func @kernel(%arg0: i32, %arg1: memref<32x64xf32, #tpu.memory_space<vmem>>, %arg2: memref<2x1x16xf32, #tpu.memory_space<vmem>>, %arg3: memref<32x64xf32, #tpu.memory_space<vmem>>, %arg4: memref<32x64xf32, #tpu.memory_space<vmem>>, %arg5: memref<32x64xf32, #tpu.memory_space<vmem>>, %arg6: memref<32x64xf32, #tpu.memory_space<vmem>>, %arg7: memref<32x64xf32, #tpu.memory_space<vmem>>, %arg8: memref<32x64xf32, #tpu.memory_space<vmem>>, %arg9: memref<64x128xbf16, #tpu.memory_space<vmem>>, %arg10: memref<64x64xbf16, #tpu.memory_space<vmem>>, %arg11: memref<64x512xbf16, #tpu.memory_space<vmem>>, %arg12: memref<256x64xbf16, #tpu.memory_space<vmem>>, %arg13: memref<64x64xf32, #tpu.memory_space<vmem>>, %arg14: memref<64x64xbf16, #tpu.memory_space<vmem>>, %arg15: memref<1x64xf32, #tpu.memory_space<vmem>>, %arg16: memref<1x64xf32, #tpu.memory_space<vmem>>, %arg17: memref<1x64xf32, #tpu.memory_space<vmem>>, %arg18: memref<1x64xf32, #tpu.memory_space<vmem>>, %arg19: memref<1x64xf32, #tpu.memory_space<vmem>>, %arg20: memref<1x32xf32, #tpu.memory_space<vmem>>, %arg21: memref<32x64xf32, #tpu.memory_space<vmem>>) attributes {dimension_semantics = [#tpu.dimension_semantics<parallel>], iteration_bounds = array<i64: 1>, scalar_prefetch = 0 : i64, scratch_operands = 0 : i64, tpu.core_type = #tpu.core_type<tc>, window_params = [{transform_indices = @transform_0, window_bounds = array<i64: 32, 64>}, {transform_indices = @transform_1, window_bounds = array<i64: 2, 1, 16>}, {transform_indices = @transform_2, window_bounds = array<i64: 32, 64>}, {transform_indices = @transform_3, window_bounds = array<i64: 32, 64>}, {transform_indices = @transform_4, window_bounds = array<i64: 32, 64>}, {transform_indices = @transform_5, window_bounds = array<i64: 32, 64>}, {transform_indices = @transform_6, window_bounds = array<i64: 32, 64>}, {transform_indices = @transform_7, window_bounds = array<i64: 32, 64>}, {pipeline_mode = #tpu.pipeline_mode<synchronous>, transform_indices = @transform_8, window_bounds = array<i64: 64, 128>}, {pipeline_mode = #tpu.pipeline_mode<synchronous>, transform_indices = @transform_9, window_bounds = array<i64: 64, 64>}, {pipeline_mode = #tpu.pipeline_mode<synchronous>, transform_indices = @transform_10, window_bounds = array<i64: 64, 512>}, {pipeline_mode = #tpu.pipeline_mode<synchronous>, transform_indices = @transform_11, window_bounds = array<i64: 256, 64>}, {pipeline_mode = #tpu.pipeline_mode<synchronous>, transform_indices = @transform_12, window_bounds = array<i64: 64, 64>}, {pipeline_mode = #tpu.pipeline_mode<synchronous>, transform_indices = @transform_13, window_bounds = array<i64: 64, 64>}, {pipeline_mode = #tpu.pipeline_mode<synchronous>, transform_indices = @transform_14, window_bounds = array<i64: 1, 64>}, {pipeline_mode = #tpu.pipeline_mode<synchronous>, transform_indices = @transform_15, window_bounds = array<i64: 1, 64>}, {pipeline_mode = #tpu.pipeline_mode<synchronous>, transform_indices = @transform_16, window_bounds = array<i64: 1, 64>}, {pipeline_mode = #tpu.pipeline_mode<synchronous>, transform_indices = @transform_17, window_bounds = array<i64: 1, 64>}, {pipeline_mode = #tpu.pipeline_mode<synchronous>, transform_indices = @transform_18, window_bounds = array<i64: 1, 64>}, {pipeline_mode = #tpu.pipeline_mode<synchronous>, transform_indices = @transform_19, window_bounds = array<i64: 1, 32>}, {transform_indices = @transform_20, window_bounds = array<i64: 32, 64>}]} {
    %c0 = arith.constant 0 : index
    %c0_0 = arith.constant 0 : index
    %0 = vector.load %arg1[%c0, %c0_0] : memref<32x64xf32, #tpu.memory_space<vmem>>, vector<32x64xf32>
    %c0_1 = arith.constant 0 : index
    %c0_2 = arith.constant 0 : index
    %1 = vector.load %arg15[%c0_1, %c0_2] : memref<1x64xf32, #tpu.memory_space<vmem>>, vector<1x64xf32>
    %2 = arith.mulf %0, %0 : vector<32x64xf32>
    %cst = arith.constant dense<0.000000e+00> : vector<32xf32>
    %3 = vector.multi_reduction <add>, %2, %cst [1] : vector<32x64xf32> to vector<32xf32>
    %4 = vector.shape_cast %3 : vector<32xf32> to vector<32x1xf32>
    %cst_3 = arith.constant 6.400000e+01 : f32
    %5 = vector.broadcast %cst_3 : f32 to vector<32x1xf32>
    %6 = arith.divf %4, %5 : vector<32x1xf32>
    %cst_4 = arith.constant 9.99999974E-6 : f32
    %7 = vector.broadcast %cst_4 : f32 to vector<32x1xf32>
    %8 = arith.addf %6, %7 : vector<32x1xf32>
    %9 = math.rsqrt %8 : vector<32x1xf32>
    %10 = vector.broadcast %9 : vector<32x1xf32> to vector<32x64xf32>
    %11 = arith.mulf %0, %10 : vector<32x64xf32>
    %12 = vector.broadcast %1 : vector<1x64xf32> to vector<32x64xf32>
    %13 = arith.mulf %11, %12 : vector<32x64xf32>
    %c0_5 = arith.constant 0 : index
    %c0_6 = arith.constant 0 : index
    %14 = vector.load %arg5[%c0_5, %c0_6] : memref<32x64xf32, #tpu.memory_space<vmem>>, vector<32x64xf32>
    %cst_7 = arith.constant 1.000000e+00 : f32
    %15 = vector.broadcast %cst_7 : f32 to vector<32x64xf32>
    %16 = arith.addf %15, %14 : vector<32x64xf32>
    %17 = arith.mulf %13, %16 : vector<32x64xf32>
    %c0_8 = arith.constant 0 : index
    %c0_9 = arith.constant 0 : index
    %18 = vector.load %arg9[%c0_8, %c0_9] : memref<64x128xbf16, #tpu.memory_space<vmem>>, vector<64x128xbf16>
    %19 = arith.truncf %17 : vector<32x64xf32> to vector<32x64xbf16>
    %cst_10 = arith.constant dense<0.000000e+00> : vector<32x128xf32>
    %20 = tpu.matmul %19, %18, %cst_10 {dimension_numbers = #tpu.dot_dimension_numbers<[1], [0], [0], [1], [0, 0, 1, 1], [], []>} : vector<32x64xbf16>, vector<64x128xbf16>, vector<32x128xf32> -> vector<32x128xf32>
    %21 = vector.extract_strided_slice %20 {offsets = [0, 0], sizes = [32, 64], strides = [1, 1]} : vector<32x128xf32> to vector<32x64xf32>
    %22 = vector.extract_strided_slice %20 {offsets = [0, 64], sizes = [32, 32], strides = [1, 1]} : vector<32x128xf32> to vector<32x32xf32>
    %23 = vector.extract_strided_slice %20 {offsets = [0, 96], sizes = [32, 32], strides = [1, 1]} : vector<32x128xf32> to vector<32x32xf32>
    %c0_11 = arith.constant 0 : index
    %c0_12 = arith.constant 0 : index
    %24 = vector.load %arg13[%c0_11, %c0_12] : memref<64x64xf32, #tpu.memory_space<vmem>>, vector<64x64xf32>
    %25 = arith.mulf %21, %21 : vector<32x64xf32>
    %cst_13 = arith.constant dense<0.000000e+00> : vector<32x64xf32>
    %26 = tpu.matmul %25, %24, %cst_13 {dimension_numbers = #tpu.dot_dimension_numbers<[1], [0], [0], [1], [0, 0, 1, 1], [], []>} : vector<32x64xf32>, vector<64x64xf32>, vector<32x64xf32> -> vector<32x64xf32>
    %cst_14 = arith.constant 9.99999997E-7 : f32
    %27 = vector.broadcast %cst_14 : f32 to vector<32x64xf32>
    %28 = arith.addf %26, %27 : vector<32x64xf32>
    %29 = math.rsqrt %28 : vector<32x64xf32>
    %30 = arith.mulf %21, %29 : vector<32x64xf32>
    %c0_15 = arith.constant 0 : index
    %c0_16 = arith.constant 0 : index
    %31 = vector.load %arg19[%c0_15, %c0_16] : memref<1x64xf32, #tpu.memory_space<vmem>>, vector<1x64xf32>
    %32 = vector.broadcast %31 : vector<1x64xf32> to vector<32x64xf32>
    %33 = arith.mulf %30, %32 : vector<32x64xf32>
    %34 = vector.extract_strided_slice %24 {offsets = [0, 0], sizes = [32, 32], strides = [1, 1]} : vector<64x64xf32> to vector<32x32xf32>
    %35 = arith.mulf %22, %22 : vector<32x32xf32>
    %cst_17 = arith.constant dense<0.000000e+00> : vector<32x32xf32>
    %36 = tpu.matmul %35, %34, %cst_17 {dimension_numbers = #tpu.dot_dimension_numbers<[1], [0], [0], [1], [0, 0, 1, 1], [], []>} : vector<32x32xf32>, vector<32x32xf32>, vector<32x32xf32> -> vector<32x32xf32>
    %cst_18 = arith.constant 9.99999997E-7 : f32
    %37 = vector.broadcast %cst_18 : f32 to vector<32x32xf32>
    %38 = arith.addf %36, %37 : vector<32x32xf32>
    %39 = math.rsqrt %38 : vector<32x32xf32>
    %40 = arith.mulf %22, %39 : vector<32x32xf32>
    %c0_19 = arith.constant 0 : index
    %c0_20 = arith.constant 0 : index
    %41 = vector.load %arg20[%c0_19, %c0_20] : memref<1x32xf32, #tpu.memory_space<vmem>>, vector<1x32xf32>
    %42 = vector.broadcast %41 : vector<1x32xf32> to vector<32x32xf32>
    %43 = arith.mulf %40, %42 : vector<32x32xf32>
    %c0_21 = arith.constant 0 : index
    %c0_22 = arith.constant 0 : index
    %44 = vector.load %arg3[%c0_21, %c0_22] : memref<32x64xf32, #tpu.memory_space<vmem>>, vector<32x64xf32>
    %c0_23 = arith.constant 0 : index
    %c0_24 = arith.constant 0 : index
    %45 = vector.load %arg4[%c0_23, %c0_24] : memref<32x64xf32, #tpu.memory_space<vmem>>, vector<32x64xf32>
    %c0_25 = arith.constant 0 : index
    %c0_26 = arith.constant 0 : index
    %46 = vector.load %arg14[%c0_25, %c0_26] : memref<64x64xbf16, #tpu.memory_space<vmem>>, vector<64x64xbf16>
    %47 = arith.mulf %33, %44 : vector<32x64xf32>
    %48 = arith.truncf %33 : vector<32x64xf32> to vector<32x64xbf16>
    %cst_27 = arith.constant dense<0.000000e+00> : vector<32x64xf32>
    %49 = tpu.matmul %48, %46, %cst_27 {dimension_numbers = #tpu.dot_dimension_numbers<[1], [0], [0], [1], [0, 0, 1, 1], [], []>} : vector<32x64xbf16>, vector<64x64xbf16>, vector<32x64xf32> -> vector<32x64xf32>
    %50 = arith.mulf %49, %45 : vector<32x64xf32>
    %51 = arith.addf %47, %50 : vector<32x64xf32>
    %52 = vector.extract_strided_slice %44 {offsets = [0, 0], sizes = [32, 32], strides = [1, 1]} : vector<32x64xf32> to vector<32x32xf32>
    %53 = arith.mulf %43, %52 : vector<32x32xf32>
    %54 = vector.extract_strided_slice %46 {offsets = [0, 0], sizes = [32, 32], strides = [1, 1]} : vector<64x64xbf16> to vector<32x32xbf16>
    %55 = arith.truncf %43 : vector<32x32xf32> to vector<32x32xbf16>
    %cst_28 = arith.constant dense<0.000000e+00> : vector<32x32xf32>
    %56 = tpu.matmul %55, %54, %cst_28 {dimension_numbers = #tpu.dot_dimension_numbers<[1], [0], [0], [1], [0, 0, 1, 1], [], []>} : vector<32x32xbf16>, vector<32x32xbf16>, vector<32x32xf32> -> vector<32x32xf32>
    %57 = vector.extract_strided_slice %45 {offsets = [0, 0], sizes = [32, 32], strides = [1, 1]} : vector<32x64xf32> to vector<32x32xf32>
    %58 = arith.mulf %56, %57 : vector<32x32xf32>
    %59 = arith.addf %53, %58 : vector<32x32xf32>
    %c0_29 = arith.constant 0 : index
    %c0_30 = arith.constant 0 : index
    %c0_31 = arith.constant 0 : index
    %60 = vector.load %arg2[%c0_29, %c0_30, %c0_31] : memref<2x1x16xf32, #tpu.memory_space<vmem>>, vector<2x1x16xf32>
    %cst_32 = arith.constant 0.000000e+00 : f32
    %61 = vector.broadcast %cst_32 : f32 to vector<2x1x16xf32>
    %62 = arith.cmpf ogt, %60, %61 : vector<2x1x16xf32>
    %cst_33 = arith.constant 0.000000e+00 : f32
    %cst_34 = arith.constant -1.000000e+30 : f32
    %63 = vector.broadcast %cst_33 : f32 to vector<2x1x16xf32>
    %64 = vector.broadcast %cst_34 : f32 to vector<2x1x16xf32>
    %65 = arith.select %62, %63, %64 : vector<2x1x16xi1>, vector<2x1x16xf32>
    %c0_35 = arith.constant 0 : index
    %c0_36 = arith.constant 0 : index
    %66 = vector.load %arg10[%c0_35, %c0_36] : memref<64x64xbf16, #tpu.memory_space<vmem>>, vector<64x64xbf16>
    %67 = vector.extract_strided_slice %51 {offsets = [0, 0], sizes = [16, 64], strides = [1, 1]} : vector<32x64xf32> to vector<16x64xf32>
    %68 = vector.extract_strided_slice %59 {offsets = [0, 0], sizes = [16, 32], strides = [1, 1]} : vector<32x32xf32> to vector<16x32xf32>
    %69 = vector.extract_strided_slice %23 {offsets = [0, 0], sizes = [16, 32], strides = [1, 1]} : vector<32x32xf32> to vector<16x32xf32>
    %70 = vector.extract_strided_slice %65 {offsets = [0, 0, 0], sizes = [1, 1, 16], strides = [1, 1, 1]} : vector<2x1x16xf32> to vector<1x1x16xf32>
    %71 = vector.shape_cast %70 : vector<1x1x16xf32> to vector<1x16xf32>
    %cst_37 = arith.constant 0.000000e+00 : f32
    %72 = vector.broadcast %cst_37 : f32 to vector<16x64xf32>
    %73 = vector.extract_strided_slice %67 {offsets = [0, 0], sizes = [16, 16], strides = [1, 1]} : vector<16x64xf32> to vector<16x16xf32>
    %74 = vector.extract_strided_slice %67 {offsets = [0, 16], sizes = [16, 16], strides = [1, 1]} : vector<16x64xf32> to vector<16x16xf32>
    %75 = tpu.concatenate %73, %74 in 0 : vector<16x16xf32>, vector<16x16xf32> -> vector<32x16xf32>
    %76 = vector.extract_strided_slice %68 {offsets = [0, 0], sizes = [16, 16], strides = [1, 1]} : vector<16x32xf32> to vector<16x16xf32>
    %77 = vector.extract_strided_slice %69 {offsets = [0, 0], sizes = [16, 16], strides = [1, 1]} : vector<16x32xf32> to vector<16x16xf32>
    %cst_38 = arith.constant dense<0.000000e+00> : vector<32x16xf32>
    %78 = tpu.matmul %75, %76, %cst_38 {dimension_numbers = #tpu.dot_dimension_numbers<[1], [1], [0], [0], [0, 0, 1, 0], [], []>} : vector<32x16xf32>, vector<16x16xf32>, vector<32x16xf32> -> vector<32x16xf32>
    %cst_39 = arith.constant 2.500000e-01 : f32
    %79 = vector.broadcast %cst_39 : f32 to vector<32x16xf32>
    %80 = arith.mulf %78, %79 : vector<32x16xf32>
    %81 = vector.broadcast %71 : vector<1x16xf32> to vector<32x16xf32>
    %82 = arith.addf %80, %81 : vector<32x16xf32>
    %cst_40 = arith.constant dense<0xFF800000> : vector<32xf32>
    %83 = vector.multi_reduction <maximumf>, %82, %cst_40 [1] : vector<32x16xf32> to vector<32xf32>
    %84 = vector.shape_cast %83 : vector<32xf32> to vector<32x1xf32>
    %85 = vector.broadcast %84 : vector<32x1xf32> to vector<32x16xf32>
    %86 = arith.subf %82, %85 : vector<32x16xf32>
    %87 = math.exp %86 : vector<32x16xf32>
    %cst_41 = arith.constant dense<0.000000e+00> : vector<32xf32>
    %88 = vector.multi_reduction <add>, %87, %cst_41 [1] : vector<32x16xf32> to vector<32xf32>
    %89 = vector.shape_cast %88 : vector<32xf32> to vector<32x1xf32>
    %90 = tpu.reciprocal %89 {approx = true} : vector<32x1xf32> -> vector<32x1xf32>
    %91 = vector.broadcast %90 : vector<32x1xf32> to vector<32x16xf32>
    %92 = arith.mulf %87, %91 : vector<32x16xf32>
    %cst_42 = arith.constant dense<0.000000e+00> : vector<32x16xf32>
    %93 = tpu.matmul %92, %77, %cst_42 {dimension_numbers = #tpu.dot_dimension_numbers<[1], [0], [0], [1], [0, 0, 1, 1], [], []>} : vector<32x16xf32>, vector<16x16xf32>, vector<32x16xf32> -> vector<32x16xf32>
    %94 = vector.extract_strided_slice %93 {offsets = [0, 0], sizes = [16, 16], strides = [1, 1]} : vector<32x16xf32> to vector<16x16xf32>
    %95 = vector.extract_strided_slice %66 {offsets = [0, 0], sizes = [16, 64], strides = [1, 1]} : vector<64x64xbf16> to vector<16x64xbf16>
    %96 = arith.truncf %94 : vector<16x16xf32> to vector<16x16xbf16>
    %cst_43 = arith.constant dense<0.000000e+00> : vector<16x64xf32>
    %97 = tpu.matmul %96, %95, %cst_43 {dimension_numbers = #tpu.dot_dimension_numbers<[1], [0], [0], [1], [0, 0, 1, 1], [], []>} : vector<16x16xbf16>, vector<16x64xbf16>, vector<16x64xf32> -> vector<16x64xf32>
    %98 = arith.addf %72, %97 : vector<16x64xf32>
    %99 = vector.extract_strided_slice %93 {offsets = [16, 0], sizes = [16, 16], strides = [1, 1]} : vector<32x16xf32> to vector<16x16xf32>
    %100 = vector.extract_strided_slice %66 {offsets = [16, 0], sizes = [16, 64], strides = [1, 1]} : vector<64x64xbf16> to vector<16x64xbf16>
    %101 = arith.truncf %99 : vector<16x16xf32> to vector<16x16xbf16>
    %cst_44 = arith.constant dense<0.000000e+00> : vector<16x64xf32>
    %102 = tpu.matmul %101, %100, %cst_44 {dimension_numbers = #tpu.dot_dimension_numbers<[1], [0], [0], [1], [0, 0, 1, 1], [], []>} : vector<16x16xbf16>, vector<16x64xbf16>, vector<16x64xf32> -> vector<16x64xf32>
    %103 = arith.addf %98, %102 : vector<16x64xf32>
    %104 = vector.extract_strided_slice %67 {offsets = [0, 32], sizes = [16, 16], strides = [1, 1]} : vector<16x64xf32> to vector<16x16xf32>
    %105 = vector.extract_strided_slice %67 {offsets = [0, 48], sizes = [16, 16], strides = [1, 1]} : vector<16x64xf32> to vector<16x16xf32>
    %106 = tpu.concatenate %104, %105 in 0 : vector<16x16xf32>, vector<16x16xf32> -> vector<32x16xf32>
    %107 = vector.extract_strided_slice %68 {offsets = [0, 16], sizes = [16, 16], strides = [1, 1]} : vector<16x32xf32> to vector<16x16xf32>
    %108 = vector.extract_strided_slice %69 {offsets = [0, 16], sizes = [16, 16], strides = [1, 1]} : vector<16x32xf32> to vector<16x16xf32>
    %cst_45 = arith.constant dense<0.000000e+00> : vector<32x16xf32>
    %109 = tpu.matmul %106, %107, %cst_45 {dimension_numbers = #tpu.dot_dimension_numbers<[1], [1], [0], [0], [0, 0, 1, 0], [], []>} : vector<32x16xf32>, vector<16x16xf32>, vector<32x16xf32> -> vector<32x16xf32>
    %cst_46 = arith.constant 2.500000e-01 : f32
    %110 = vector.broadcast %cst_46 : f32 to vector<32x16xf32>
    %111 = arith.mulf %109, %110 : vector<32x16xf32>
    %112 = vector.broadcast %71 : vector<1x16xf32> to vector<32x16xf32>
    %113 = arith.addf %111, %112 : vector<32x16xf32>
    %cst_47 = arith.constant dense<0xFF800000> : vector<32xf32>
    %114 = vector.multi_reduction <maximumf>, %113, %cst_47 [1] : vector<32x16xf32> to vector<32xf32>
    %115 = vector.shape_cast %114 : vector<32xf32> to vector<32x1xf32>
    %116 = vector.broadcast %115 : vector<32x1xf32> to vector<32x16xf32>
    %117 = arith.subf %113, %116 : vector<32x16xf32>
    %118 = math.exp %117 : vector<32x16xf32>
    %cst_48 = arith.constant dense<0.000000e+00> : vector<32xf32>
    %119 = vector.multi_reduction <add>, %118, %cst_48 [1] : vector<32x16xf32> to vector<32xf32>
    %120 = vector.shape_cast %119 : vector<32xf32> to vector<32x1xf32>
    %121 = tpu.reciprocal %120 {approx = true} : vector<32x1xf32> -> vector<32x1xf32>
    %122 = vector.broadcast %121 : vector<32x1xf32> to vector<32x16xf32>
    %123 = arith.mulf %118, %122 : vector<32x16xf32>
    %cst_49 = arith.constant dense<0.000000e+00> : vector<32x16xf32>
    %124 = tpu.matmul %123, %108, %cst_49 {dimension_numbers = #tpu.dot_dimension_numbers<[1], [0], [0], [1], [0, 0, 1, 1], [], []>} : vector<32x16xf32>, vector<16x16xf32>, vector<32x16xf32> -> vector<32x16xf32>
    %125 = vector.extract_strided_slice %124 {offsets = [0, 0], sizes = [16, 16], strides = [1, 1]} : vector<32x16xf32> to vector<16x16xf32>
    %126 = vector.extract_strided_slice %66 {offsets = [32, 0], sizes = [16, 64], strides = [1, 1]} : vector<64x64xbf16> to vector<16x64xbf16>
    %127 = arith.truncf %125 : vector<16x16xf32> to vector<16x16xbf16>
    %cst_50 = arith.constant dense<0.000000e+00> : vector<16x64xf32>
    %128 = tpu.matmul %127, %126, %cst_50 {dimension_numbers = #tpu.dot_dimension_numbers<[1], [0], [0], [1], [0, 0, 1, 1], [], []>} : vector<16x16xbf16>, vector<16x64xbf16>, vector<16x64xf32> -> vector<16x64xf32>
    %129 = arith.addf %103, %128 : vector<16x64xf32>
    %130 = vector.extract_strided_slice %124 {offsets = [16, 0], sizes = [16, 16], strides = [1, 1]} : vector<32x16xf32> to vector<16x16xf32>
    %131 = vector.extract_strided_slice %66 {offsets = [48, 0], sizes = [16, 64], strides = [1, 1]} : vector<64x64xbf16> to vector<16x64xbf16>
    %132 = arith.truncf %130 : vector<16x16xf32> to vector<16x16xbf16>
    %cst_51 = arith.constant dense<0.000000e+00> : vector<16x64xf32>
    %133 = tpu.matmul %132, %131, %cst_51 {dimension_numbers = #tpu.dot_dimension_numbers<[1], [0], [0], [1], [0, 0, 1, 1], [], []>} : vector<16x16xbf16>, vector<16x64xbf16>, vector<16x64xf32> -> vector<16x64xf32>
    %134 = arith.addf %129, %133 : vector<16x64xf32>
    %135 = vector.extract_strided_slice %51 {offsets = [16, 0], sizes = [16, 64], strides = [1, 1]} : vector<32x64xf32> to vector<16x64xf32>
    %136 = vector.extract_strided_slice %59 {offsets = [16, 0], sizes = [16, 32], strides = [1, 1]} : vector<32x32xf32> to vector<16x32xf32>
    %137 = vector.extract_strided_slice %23 {offsets = [16, 0], sizes = [16, 32], strides = [1, 1]} : vector<32x32xf32> to vector<16x32xf32>
    %138 = vector.extract_strided_slice %65 {offsets = [1, 0, 0], sizes = [1, 1, 16], strides = [1, 1, 1]} : vector<2x1x16xf32> to vector<1x1x16xf32>
    %139 = vector.shape_cast %138 : vector<1x1x16xf32> to vector<1x16xf32>
    %cst_52 = arith.constant 0.000000e+00 : f32
    %140 = vector.broadcast %cst_52 : f32 to vector<16x64xf32>
    %141 = vector.extract_strided_slice %135 {offsets = [0, 0], sizes = [16, 16], strides = [1, 1]} : vector<16x64xf32> to vector<16x16xf32>
    %142 = vector.extract_strided_slice %135 {offsets = [0, 16], sizes = [16, 16], strides = [1, 1]} : vector<16x64xf32> to vector<16x16xf32>
    %143 = tpu.concatenate %141, %142 in 0 : vector<16x16xf32>, vector<16x16xf32> -> vector<32x16xf32>
    %144 = vector.extract_strided_slice %136 {offsets = [0, 0], sizes = [16, 16], strides = [1, 1]} : vector<16x32xf32> to vector<16x16xf32>
    %145 = vector.extract_strided_slice %137 {offsets = [0, 0], sizes = [16, 16], strides = [1, 1]} : vector<16x32xf32> to vector<16x16xf32>
    %cst_53 = arith.constant dense<0.000000e+00> : vector<32x16xf32>
    %146 = tpu.matmul %143, %144, %cst_53 {dimension_numbers = #tpu.dot_dimension_numbers<[1], [1], [0], [0], [0, 0, 1, 0], [], []>} : vector<32x16xf32>, vector<16x16xf32>, vector<32x16xf32> -> vector<32x16xf32>
    %cst_54 = arith.constant 2.500000e-01 : f32
    %147 = vector.broadcast %cst_54 : f32 to vector<32x16xf32>
    %148 = arith.mulf %146, %147 : vector<32x16xf32>
    %149 = vector.broadcast %139 : vector<1x16xf32> to vector<32x16xf32>
    %150 = arith.addf %148, %149 : vector<32x16xf32>
    %cst_55 = arith.constant dense<0xFF800000> : vector<32xf32>
    %151 = vector.multi_reduction <maximumf>, %150, %cst_55 [1] : vector<32x16xf32> to vector<32xf32>
    %152 = vector.shape_cast %151 : vector<32xf32> to vector<32x1xf32>
    %153 = vector.broadcast %152 : vector<32x1xf32> to vector<32x16xf32>
    %154 = arith.subf %150, %153 : vector<32x16xf32>
    %155 = math.exp %154 : vector<32x16xf32>
    %cst_56 = arith.constant dense<0.000000e+00> : vector<32xf32>
    %156 = vector.multi_reduction <add>, %155, %cst_56 [1] : vector<32x16xf32> to vector<32xf32>
    %157 = vector.shape_cast %156 : vector<32xf32> to vector<32x1xf32>
    %158 = tpu.reciprocal %157 {approx = true} : vector<32x1xf32> -> vector<32x1xf32>
    %159 = vector.broadcast %158 : vector<32x1xf32> to vector<32x16xf32>
    %160 = arith.mulf %155, %159 : vector<32x16xf32>
    %cst_57 = arith.constant dense<0.000000e+00> : vector<32x16xf32>
    %161 = tpu.matmul %160, %145, %cst_57 {dimension_numbers = #tpu.dot_dimension_numbers<[1], [0], [0], [1], [0, 0, 1, 1], [], []>} : vector<32x16xf32>, vector<16x16xf32>, vector<32x16xf32> -> vector<32x16xf32>
    %162 = vector.extract_strided_slice %161 {offsets = [0, 0], sizes = [16, 16], strides = [1, 1]} : vector<32x16xf32> to vector<16x16xf32>
    %163 = vector.extract_strided_slice %66 {offsets = [0, 0], sizes = [16, 64], strides = [1, 1]} : vector<64x64xbf16> to vector<16x64xbf16>
    %164 = arith.truncf %162 : vector<16x16xf32> to vector<16x16xbf16>
    %cst_58 = arith.constant dense<0.000000e+00> : vector<16x64xf32>
    %165 = tpu.matmul %164, %163, %cst_58 {dimension_numbers = #tpu.dot_dimension_numbers<[1], [0], [0], [1], [0, 0, 1, 1], [], []>} : vector<16x16xbf16>, vector<16x64xbf16>, vector<16x64xf32> -> vector<16x64xf32>
    %166 = arith.addf %140, %165 : vector<16x64xf32>
    %167 = vector.extract_strided_slice %161 {offsets = [16, 0], sizes = [16, 16], strides = [1, 1]} : vector<32x16xf32> to vector<16x16xf32>
    %168 = vector.extract_strided_slice %66 {offsets = [16, 0], sizes = [16, 64], strides = [1, 1]} : vector<64x64xbf16> to vector<16x64xbf16>
    %169 = arith.truncf %167 : vector<16x16xf32> to vector<16x16xbf16>
    %cst_59 = arith.constant dense<0.000000e+00> : vector<16x64xf32>
    %170 = tpu.matmul %169, %168, %cst_59 {dimension_numbers = #tpu.dot_dimension_numbers<[1], [0], [0], [1], [0, 0, 1, 1], [], []>} : vector<16x16xbf16>, vector<16x64xbf16>, vector<16x64xf32> -> vector<16x64xf32>
    %171 = arith.addf %166, %170 : vector<16x64xf32>
    %172 = vector.extract_strided_slice %135 {offsets = [0, 32], sizes = [16, 16], strides = [1, 1]} : vector<16x64xf32> to vector<16x16xf32>
    %173 = vector.extract_strided_slice %135 {offsets = [0, 48], sizes = [16, 16], strides = [1, 1]} : vector<16x64xf32> to vector<16x16xf32>
    %174 = tpu.concatenate %172, %173 in 0 : vector<16x16xf32>, vector<16x16xf32> -> vector<32x16xf32>
    %175 = vector.extract_strided_slice %136 {offsets = [0, 16], sizes = [16, 16], strides = [1, 1]} : vector<16x32xf32> to vector<16x16xf32>
    %176 = vector.extract_strided_slice %137 {offsets = [0, 16], sizes = [16, 16], strides = [1, 1]} : vector<16x32xf32> to vector<16x16xf32>
    %cst_60 = arith.constant dense<0.000000e+00> : vector<32x16xf32>
    %177 = tpu.matmul %174, %175, %cst_60 {dimension_numbers = #tpu.dot_dimension_numbers<[1], [1], [0], [0], [0, 0, 1, 0], [], []>} : vector<32x16xf32>, vector<16x16xf32>, vector<32x16xf32> -> vector<32x16xf32>
    %cst_61 = arith.constant 2.500000e-01 : f32
    %178 = vector.broadcast %cst_61 : f32 to vector<32x16xf32>
    %179 = arith.mulf %177, %178 : vector<32x16xf32>
    %180 = vector.broadcast %139 : vector<1x16xf32> to vector<32x16xf32>
    %181 = arith.addf %179, %180 : vector<32x16xf32>
    %cst_62 = arith.constant dense<0xFF800000> : vector<32xf32>
    %182 = vector.multi_reduction <maximumf>, %181, %cst_62 [1] : vector<32x16xf32> to vector<32xf32>
    %183 = vector.shape_cast %182 : vector<32xf32> to vector<32x1xf32>
    %184 = vector.broadcast %183 : vector<32x1xf32> to vector<32x16xf32>
    %185 = arith.subf %181, %184 : vector<32x16xf32>
    %186 = math.exp %185 : vector<32x16xf32>
    %cst_63 = arith.constant dense<0.000000e+00> : vector<32xf32>
    %187 = vector.multi_reduction <add>, %186, %cst_63 [1] : vector<32x16xf32> to vector<32xf32>
    %188 = vector.shape_cast %187 : vector<32xf32> to vector<32x1xf32>
    %189 = tpu.reciprocal %188 {approx = true} : vector<32x1xf32> -> vector<32x1xf32>
    %190 = vector.broadcast %189 : vector<32x1xf32> to vector<32x16xf32>
    %191 = arith.mulf %186, %190 : vector<32x16xf32>
    %cst_64 = arith.constant dense<0.000000e+00> : vector<32x16xf32>
    %192 = tpu.matmul %191, %176, %cst_64 {dimension_numbers = #tpu.dot_dimension_numbers<[1], [0], [0], [1], [0, 0, 1, 1], [], []>} : vector<32x16xf32>, vector<16x16xf32>, vector<32x16xf32> -> vector<32x16xf32>
    %193 = vector.extract_strided_slice %192 {offsets = [0, 0], sizes = [16, 16], strides = [1, 1]} : vector<32x16xf32> to vector<16x16xf32>
    %194 = vector.extract_strided_slice %66 {offsets = [32, 0], sizes = [16, 64], strides = [1, 1]} : vector<64x64xbf16> to vector<16x64xbf16>
    %195 = arith.truncf %193 : vector<16x16xf32> to vector<16x16xbf16>
    %cst_65 = arith.constant dense<0.000000e+00> : vector<16x64xf32>
    %196 = tpu.matmul %195, %194, %cst_65 {dimension_numbers = #tpu.dot_dimension_numbers<[1], [0], [0], [1], [0, 0, 1, 1], [], []>} : vector<16x16xbf16>, vector<16x64xbf16>, vector<16x64xf32> -> vector<16x64xf32>
    %197 = arith.addf %171, %196 : vector<16x64xf32>
    %198 = vector.extract_strided_slice %192 {offsets = [16, 0], sizes = [16, 16], strides = [1, 1]} : vector<32x16xf32> to vector<16x16xf32>
    %199 = vector.extract_strided_slice %66 {offsets = [48, 0], sizes = [16, 64], strides = [1, 1]} : vector<64x64xbf16> to vector<16x64xbf16>
    %200 = arith.truncf %198 : vector<16x16xf32> to vector<16x16xbf16>
    %cst_66 = arith.constant dense<0.000000e+00> : vector<16x64xf32>
    %201 = tpu.matmul %200, %199, %cst_66 {dimension_numbers = #tpu.dot_dimension_numbers<[1], [0], [0], [1], [0, 0, 1, 1], [], []>} : vector<16x16xbf16>, vector<16x64xbf16>, vector<16x64xf32> -> vector<16x64xf32>
    %202 = arith.addf %197, %201 : vector<16x64xf32>
    %203 = tpu.concatenate %134, %202 in 0 : vector<16x64xf32>, vector<16x64xf32> -> vector<32x64xf32>
    %c0_67 = arith.constant 0 : index
    %c0_68 = arith.constant 0 : index
    %204 = vector.load %arg6[%c0_67, %c0_68] : memref<32x64xf32, #tpu.memory_space<vmem>>, vector<32x64xf32>
    %c0_69 = arith.constant 0 : index
    %c0_70 = arith.constant 0 : index
    %205 = vector.load %arg16[%c0_69, %c0_70] : memref<1x64xf32, #tpu.memory_space<vmem>>, vector<1x64xf32>
    %206 = arith.mulf %203, %203 : vector<32x64xf32>
    %cst_71 = arith.constant dense<0.000000e+00> : vector<32xf32>
    %207 = vector.multi_reduction <add>, %206, %cst_71 [1] : vector<32x64xf32> to vector<32xf32>
    %208 = vector.shape_cast %207 : vector<32xf32> to vector<32x1xf32>
    %cst_72 = arith.constant 6.400000e+01 : f32
    %209 = vector.broadcast %cst_72 : f32 to vector<32x1xf32>
    %210 = arith.divf %208, %209 : vector<32x1xf32>
    %cst_73 = arith.constant 9.99999974E-6 : f32
    %211 = vector.broadcast %cst_73 : f32 to vector<32x1xf32>
    %212 = arith.addf %210, %211 : vector<32x1xf32>
    %213 = math.rsqrt %212 : vector<32x1xf32>
    %214 = vector.broadcast %213 : vector<32x1xf32> to vector<32x64xf32>
    %215 = arith.mulf %203, %214 : vector<32x64xf32>
    %216 = vector.broadcast %205 : vector<1x64xf32> to vector<32x64xf32>
    %217 = arith.mulf %215, %216 : vector<32x64xf32>
    %218 = arith.mulf %204, %217 : vector<32x64xf32>
    %219 = arith.addf %0, %218 : vector<32x64xf32>
    %c0_74 = arith.constant 0 : index
    %c0_75 = arith.constant 0 : index
    %220 = vector.load %arg17[%c0_74, %c0_75] : memref<1x64xf32, #tpu.memory_space<vmem>>, vector<1x64xf32>
    %221 = arith.mulf %219, %219 : vector<32x64xf32>
    %cst_76 = arith.constant dense<0.000000e+00> : vector<32xf32>
    %222 = vector.multi_reduction <add>, %221, %cst_76 [1] : vector<32x64xf32> to vector<32xf32>
    %223 = vector.shape_cast %222 : vector<32xf32> to vector<32x1xf32>
    %cst_77 = arith.constant 6.400000e+01 : f32
    %224 = vector.broadcast %cst_77 : f32 to vector<32x1xf32>
    %225 = arith.divf %223, %224 : vector<32x1xf32>
    %cst_78 = arith.constant 9.99999974E-6 : f32
    %226 = vector.broadcast %cst_78 : f32 to vector<32x1xf32>
    %227 = arith.addf %225, %226 : vector<32x1xf32>
    %228 = math.rsqrt %227 : vector<32x1xf32>
    %229 = vector.broadcast %228 : vector<32x1xf32> to vector<32x64xf32>
    %230 = arith.mulf %219, %229 : vector<32x64xf32>
    %231 = vector.broadcast %220 : vector<1x64xf32> to vector<32x64xf32>
    %232 = arith.mulf %230, %231 : vector<32x64xf32>
    %c0_79 = arith.constant 0 : index
    %c0_80 = arith.constant 0 : index
    %233 = vector.load %arg7[%c0_79, %c0_80] : memref<32x64xf32, #tpu.memory_space<vmem>>, vector<32x64xf32>
    %cst_81 = arith.constant 1.000000e+00 : f32
    %234 = vector.broadcast %cst_81 : f32 to vector<32x64xf32>
    %235 = arith.addf %234, %233 : vector<32x64xf32>
    %236 = arith.mulf %232, %235 : vector<32x64xf32>
    %c0_82 = arith.constant 0 : index
    %c0_83 = arith.constant 0 : index
    %237 = vector.load %arg11[%c0_82, %c0_83] : memref<64x512xbf16, #tpu.memory_space<vmem>>, vector<64x512xbf16>
    %238 = arith.truncf %236 : vector<32x64xf32> to vector<32x64xbf16>
    %cst_84 = arith.constant dense<0.000000e+00> : vector<32x512xf32>
    %239 = tpu.matmul %238, %237, %cst_84 {dimension_numbers = #tpu.dot_dimension_numbers<[1], [0], [0], [1], [0, 0, 1, 1], [], []>} : vector<32x64xbf16>, vector<64x512xbf16>, vector<32x512xf32> -> vector<32x512xf32>
    %240 = vector.extract_strided_slice %239 {offsets = [0, 0], sizes = [32, 256], strides = [1, 1]} : vector<32x512xf32> to vector<32x256xf32>
    %241 = vector.extract_strided_slice %239 {offsets = [0, 256], sizes = [32, 256], strides = [1, 1]} : vector<32x512xf32> to vector<32x256xf32>
    %242 = arith.negf %240 : vector<32x256xf32>
    %243 = math.exp %242 : vector<32x256xf32>
    %cst_85 = arith.constant 1.000000e+00 : f32
    %244 = vector.broadcast %cst_85 : f32 to vector<32x256xf32>
    %245 = arith.addf %244, %243 : vector<32x256xf32>
    %246 = arith.divf %244, %245 : vector<32x256xf32>
    %247 = arith.mulf %240, %246 : vector<32x256xf32>
    %248 = arith.mulf %247, %241 : vector<32x256xf32>
    %c0_86 = arith.constant 0 : index
    %c0_87 = arith.constant 0 : index
    %249 = vector.load %arg12[%c0_86, %c0_87] : memref<256x64xbf16, #tpu.memory_space<vmem>>, vector<256x64xbf16>
    %250 = arith.truncf %248 : vector<32x256xf32> to vector<32x256xbf16>
    %cst_88 = arith.constant dense<0.000000e+00> : vector<32x64xf32>
    %251 = tpu.matmul %250, %249, %cst_88 {dimension_numbers = #tpu.dot_dimension_numbers<[1], [0], [0], [1], [0, 0, 1, 1], [], []>} : vector<32x256xbf16>, vector<256x64xbf16>, vector<32x64xf32> -> vector<32x64xf32>
    %c0_89 = arith.constant 0 : index
    %c0_90 = arith.constant 0 : index
    %252 = vector.load %arg8[%c0_89, %c0_90] : memref<32x64xf32, #tpu.memory_space<vmem>>, vector<32x64xf32>
    %c0_91 = arith.constant 0 : index
    %c0_92 = arith.constant 0 : index
    %253 = vector.load %arg18[%c0_91, %c0_92] : memref<1x64xf32, #tpu.memory_space<vmem>>, vector<1x64xf32>
    %254 = arith.mulf %251, %251 : vector<32x64xf32>
    %cst_93 = arith.constant dense<0.000000e+00> : vector<32xf32>
    %255 = vector.multi_reduction <add>, %254, %cst_93 [1] : vector<32x64xf32> to vector<32xf32>
    %256 = vector.shape_cast %255 : vector<32xf32> to vector<32x1xf32>
    %cst_94 = arith.constant 6.400000e+01 : f32
    %257 = vector.broadcast %cst_94 : f32 to vector<32x1xf32>
    %258 = arith.divf %256, %257 : vector<32x1xf32>
    %cst_95 = arith.constant 9.99999974E-6 : f32
    %259 = vector.broadcast %cst_95 : f32 to vector<32x1xf32>
    %260 = arith.addf %258, %259 : vector<32x1xf32>
    %261 = math.rsqrt %260 : vector<32x1xf32>
    %262 = vector.broadcast %261 : vector<32x1xf32> to vector<32x64xf32>
    %263 = arith.mulf %251, %262 : vector<32x64xf32>
    %264 = vector.broadcast %253 : vector<1x64xf32> to vector<32x64xf32>
    %265 = arith.mulf %263, %264 : vector<32x64xf32>
    %266 = arith.mulf %252, %265 : vector<32x64xf32>
    %267 = arith.addf %219, %266 : vector<32x64xf32>
    %c0_96 = arith.constant 0 : index
    %c0_97 = arith.constant 0 : index
    %268 = vector.load %arg21[%c0_96, %c0_97] : memref<32x64xf32, #tpu.memory_space<vmem>>, vector<32x64xf32>
    tpu.vector_store %arg21[%c0_96, %c0_97], %267 {strides = array<i32>} : memref<32x64xf32, #tpu.memory_space<vmem>>, vector<32x64xf32>,
    return
  }
  func.func @transform_0(%arg0: i32) -> (i32, i32) {
    %c0_i32 = arith.constant 0 : i32
    %c0_i32_0 = arith.constant 0 : i32
    return %arg0, %c0_i32 : i32, i32
  }
  func.func @transform_1(%arg0: i32) -> (i32, i32, i32) {
    %c0_i32 = arith.constant 0 : i32
    %c0_i32_0 = arith.constant 0 : i32
    %c0_i32_1 = arith.constant 0 : i32
    return %arg0, %c0_i32, %c0_i32_0 : i32, i32, i32
  }
  func.func @transform_2(%arg0: i32) -> (i32, i32) {
    %c0_i32 = arith.constant 0 : i32
    %c0_i32_0 = arith.constant 0 : i32
    return %arg0, %c0_i32 : i32, i32
  }
  func.func @transform_3(%arg0: i32) -> (i32, i32) {
    %c0_i32 = arith.constant 0 : i32
    %c0_i32_0 = arith.constant 0 : i32
    return %arg0, %c0_i32 : i32, i32
  }
  func.func @transform_4(%arg0: i32) -> (i32, i32) {
    %c0_i32 = arith.constant 0 : i32
    %c0_i32_0 = arith.constant 0 : i32
    return %arg0, %c0_i32 : i32, i32
  }
  func.func @transform_5(%arg0: i32) -> (i32, i32) {
    %c0_i32 = arith.constant 0 : i32
    %c0_i32_0 = arith.constant 0 : i32
    return %arg0, %c0_i32 : i32, i32
  }
  func.func @transform_6(%arg0: i32) -> (i32, i32) {
    %c0_i32 = arith.constant 0 : i32
    %c0_i32_0 = arith.constant 0 : i32
    return %arg0, %c0_i32 : i32, i32
  }
  func.func @transform_7(%arg0: i32) -> (i32, i32) {
    %c0_i32 = arith.constant 0 : i32
    %c0_i32_0 = arith.constant 0 : i32
    return %arg0, %c0_i32 : i32, i32
  }
  func.func @transform_8(%arg0: i32) -> (i32, i32) {
    %c0_i32 = arith.constant 0 : i32
    %c0_i32_0 = arith.constant 0 : i32
    %c0_i32_1 = arith.constant 0 : i32
    return %c0_i32, %c0_i32_0 : i32, i32
  }
  func.func @transform_9(%arg0: i32) -> (i32, i32) {
    %c0_i32 = arith.constant 0 : i32
    %c0_i32_0 = arith.constant 0 : i32
    %c0_i32_1 = arith.constant 0 : i32
    return %c0_i32, %c0_i32_0 : i32, i32
  }
  func.func @transform_10(%arg0: i32) -> (i32, i32) {
    %c0_i32 = arith.constant 0 : i32
    %c0_i32_0 = arith.constant 0 : i32
    %c0_i32_1 = arith.constant 0 : i32
    return %c0_i32, %c0_i32_0 : i32, i32
  }
  func.func @transform_11(%arg0: i32) -> (i32, i32) {
    %c0_i32 = arith.constant 0 : i32
    %c0_i32_0 = arith.constant 0 : i32
    %c0_i32_1 = arith.constant 0 : i32
    return %c0_i32, %c0_i32_0 : i32, i32
  }
  func.func @transform_12(%arg0: i32) -> (i32, i32) {
    %c0_i32 = arith.constant 0 : i32
    %c0_i32_0 = arith.constant 0 : i32
    %c0_i32_1 = arith.constant 0 : i32
    return %c0_i32, %c0_i32_0 : i32, i32
  }
  func.func @transform_13(%arg0: i32) -> (i32, i32) {
    %c0_i32 = arith.constant 0 : i32
    %c0_i32_0 = arith.constant 0 : i32
    %c0_i32_1 = arith.constant 0 : i32
    return %c0_i32, %c0_i32_0 : i32, i32
  }
  func.func @transform_14(%arg0: i32) -> (i32, i32) {
    %c0_i32 = arith.constant 0 : i32
    %c0_i32_0 = arith.constant 0 : i32
    %c0_i32_1 = arith.constant 0 : i32
    return %c0_i32, %c0_i32_0 : i32, i32
  }
  func.func @transform_15(%arg0: i32) -> (i32, i32) {
    %c0_i32 = arith.constant 0 : i32
    %c0_i32_0 = arith.constant 0 : i32
    %c0_i32_1 = arith.constant 0 : i32
    return %c0_i32, %c0_i32_0 : i32, i32
  }
  func.func @transform_16(%arg0: i32) -> (i32, i32) {
    %c0_i32 = arith.constant 0 : i32
    %c0_i32_0 = arith.constant 0 : i32
    %c0_i32_1 = arith.constant 0 : i32
    return %c0_i32, %c0_i32_0 : i32, i32
  }
  func.func @transform_17(%arg0: i32) -> (i32, i32) {
    %c0_i32 = arith.constant 0 : i32
    %c0_i32_0 = arith.constant 0 : i32
    %c0_i32_1 = arith.constant 0 : i32
    return %c0_i32, %c0_i32_0 : i32, i32
  }
  func.func @transform_18(%arg0: i32) -> (i32, i32) {
    %c0_i32 = arith.constant 0 : i32
    %c0_i32_0 = arith.constant 0 : i32
    %c0_i32_1 = arith.constant 0 : i32
    return %c0_i32, %c0_i32_0 : i32, i32
  }
  func.func @transform_19(%arg0: i32) -> (i32, i32) {
    %c0_i32 = arith.constant 0 : i32
    %c0_i32_0 = arith.constant 0 : i32
    %c0_i32_1 = arith.constant 0 : i32
    return %c0_i32, %c0_i32_0 : i32, i32
  }
  func.func @transform_20(%arg0: i32) -> (i32, i32) {
    %c0_i32 = arith.constant 0 : i32
    %c0_i32_0 = arith.constant 0 : i32
    return %arg0, %c0_i32 : i32, i32
  }
}

</mosaic_0001>

<bundles_post_ra>
// kernel: tpu_custom_call.1
= control target key start
LH: loop header
LB: loop body
LE: loop exit
PB: predicated region body
PF: predicated region fallthrough
CT: control target
= control target key end

     0   :  { %s4861_s0 = inlined_call_operand.vmem [shape: f32[32,64], index: 0, kind: input, shape index: {}]   ;;  %s4862_s1 = inlined_call_operand.vmem [shape: f32[2,1,16], index: 1, kind: input, shape index: {}]   ;;  %s4863_s2 = inlined_call_operand.hbm [shape: f32[32,64], index: 2, kind: input, shape index: {}]   ;;  %s4864_s3 = inlined_call_operand.hbm [shape: f32[32,64], index: 3, kind: input, shape index: {}]   ;;  %s4865_s4 = inlined_call_operand.hbm [shape: f32[32,64], index: 4, kind: input, shape index: {}]   ;;  %s4866_s5 = inlined_call_operand.hbm [shape: f32[32,64], index: 5, kind: input, shape index: {}]   ;;  %s4867_s6 = inlined_call_operand.hbm [shape: f32[32,64], index: 6, kind: input, shape index: {}]   ;;  %s4868_s7 = inlined_call_operand.hbm [shape: f32[32,64], index: 7, kind: input, shape index: {}]   ;;  %s4869_s8 = inlined_call_operand.hbm [shape: bf16[64,128], index: 8, kind: input, shape index: {}]   ;;  %s4870_s9 = inlined_call_operand.hbm [shape: bf16[64,64], index: 9, kind: input, shape index: {}]   ;;  %s4871_s10 = inlined_call_operand.vmem [shape: bf16[64,512], index: 10, kind: input, shape index: {}]   ;;  %s4872_s11 = inlined_call_operand.vmem [shape: bf16[256,64], index: 11, kind: input, shape index: {}]   ;;  %s4873_s12 = inlined_call_operand.vmem [shape: f32[64,64], index: 12, kind: input, shape index: {}]   ;;  %s4874_s13 = inlined_call_operand.hbm [shape: bf16[64,64], index: 13, kind: input, shape index: {}]   ;;  %s4875_s14 = inlined_call_operand.vmem [shape: f32[1,64], index: 14, kind: input, shape index: {}]   ;;  %s4876_s15 = inlined_call_operand.vmem [shape: f32[1,64], index: 15, kind: input, shape index: {}]   ;;  %s4877_s16 = inlined_call_operand.vmem [shape: f32[1,64], index: 16, kind: input, shape index: {}]   ;;  %s4878_s17 = inlined_call_operand.vmem [shape: f32[1,64], index: 17, kind: input, shape index: {}]   ;;  %s4879_s18 = inlined_call_operand.vmem [shape: f32[1,64], index: 18, kind: input, shape index: {}]   ;;  %s4880_s19 = inlined_call_operand.vmem [shape: f32[1,32], index: 19, kind: input, shape index: {}]   ;;  %s4881_s20 = inlined_call_operand.hbm [shape: f32[32,64], index: 20, kind: output, shape index: {}]  }
   0x1   :  { %4891 = sst [smem:[#allocation24_spill]] %s4861_s0 }
   0x2   :  { %4892 = sst [smem:[#allocation25_spill]] %s4862_s1 }
   0x3   :  { %4893 = sst [smem:[#allocation26_spill]] %s4863_s2 }
   0x4   :  { %4894 = sst [smem:[#allocation27_spill]] %s4864_s3 }
   0x5   :  { %4895 = sst [smem:[#allocation28_spill]] %s4865_s4 }
   0x6   :  { %25 = vsyncpa [#allocation3], 0 }
   0x7   :  { %26 = vsyncpa [#allocation6], 0 }
   0x8   :  { %27 = vsyncpa [#allocation9], 0 }
   0x9   :  { %28 = vsyncpa [#allocation12], 0 }
   0xa   :  { %29 = vsyncpa [#allocation15], 0 }
   0xb   :  { %30 = vsyncpa [#allocation4], 0  ;;  %s3977_s1 = smov [#allocation5]   ;;  %s3978_s23 = smov [#allocation8]  }
   0xc   :  { %s52_s22 = sshll.u32 %s3977_s1, 4  ;;  %s76_s24 = sshll.u32 %s3978_s23, 4  ;;  %s53_s22 = int_to_ptr.vmem [resolvable:$true] %s52_s22  ;;  %s4105_s24 = int_to_ptr.vmem [resolvable:$true] %s76_s24 }
   0xd   :  { %s4896_s3 = sld [smem:[#allocation27_spill]] }
  0x13   :  { %s3745_s26 = scalar_lea.hbm %s4896_s3, 512 }
  0x14   :  { %p3746_p0 = scmp.ne.s32.totalorder %s4896_s3, %s3745_s26  ;;  %p3749_p1 = scmp.lt.u32.totalorder %s3745_s26, %s4896_s3 }
  0x16   :  { %p3751_p2 = pnand %p3749_p1, %p3746_p0 }
  0x18   :  { %3754 = shalt.err (!%p3751_p2)
}
  0x19   :  { %s3755_s30 = scalar_lea.vmem %s53_s22, 512  ;;  %p3760_p4 = scmp.lt.s32.totalorder %s53_s22, %s53_s22 }
  0x1a   :  { %p3756_p3 = scmp.ne.s32.totalorder %s53_s22, %s3755_s30  ;;  %p3761_p5 = scmp.lt.s32.totalorder %s3755_s30, %s3755_s30 }
  0x1c   :  { %p3762_p6 = por %p3761_p5, %p3760_p4 }
  0x1e   :  { %p3763_p7 = pnand %p3762_p6, %p3756_p3 }
  0x20   :  { %3766 = shalt.err (!%p3763_p7)
}
  0x21   :  { %s3979_s0 = smov 128   ;;  %s3980_s21 = smov 8  }
  0x22   :  { %58 = dma.hbm_to_vmem [thread:$0]  %s4896_s3, 512, %s53_s22, [#allocation6], %s3979_s0, %s3979_s0, %s3980_s21  }
  0x23   :  { %s3767_s26 = scalar_lea.hbm %s4866_s5, 512 }
  0x24   :  { %p3768_p8 = scmp.ne.s32.totalorder %s4866_s5, %s3767_s26  ;;  %p3771_p9 = scmp.lt.u32.totalorder %s3767_s26, %s4866_s5 }
  0x26   :  { %p3773_p10 = pnand %p3771_p9, %p3768_p8 }
  0x28   :  { %3776 = shalt.err (!%p3773_p10)
}
  0x29   :  { %s3777_s30 = scalar_lea.vmem %s4105_s24, 512  ;;  %p3782_p12 = scmp.lt.s32.totalorder %s4105_s24, %s4105_s24 }
  0x2a   :  { %p3778_p11 = scmp.ne.s32.totalorder %s4105_s24, %s3777_s30  ;;  %p3783_p13 = scmp.lt.s32.totalorder %s3777_s30, %s3777_s30 }
  0x2c   :  { %p3784_p0 = por %p3783_p13, %p3782_p12 }
  0x2e   :  { %p3785_p1 = pnand %p3784_p0, %p3778_p11 }
  0x30   :  { %3788 = shalt.err (!%p3785_p1)
}
  0x31   :  { %82 = dma.hbm_to_vmem [thread:$0]  %s4866_s5, 512, %s4105_s24, [#allocation9], %s3979_s0, %s3979_s0, %s3980_s21  }
  0x32   :  { %s3981_s1 = smov [#allocation11]   ;;  %s3789_s26 = scalar_lea.hbm %s4868_s7, 512 }
  0x33   :  { %s100_s23 = sshll.u32 %s3981_s1, 4  ;;  %p3790_p2 = scmp.ne.s32.totalorder %s4868_s7, %s3789_s26  ;;  %s101_s23 = int_to_ptr.vmem [resolvable:$true] %s100_s23 }
  0x34   :  { %p3793_p3 = scmp.lt.u32.totalorder %s3789_s26, %s4868_s7 }
  0x36   :  { %p3795_p4 = pnand %p3793_p3, %p3790_p2 }
  0x38   :  { %3798 = shalt.err (!%p3795_p4)
}
  0x39   :  { %s3799_s30 = scalar_lea.vmem %s101_s23, 512  ;;  %p3804_p6 = scmp.lt.s32.totalorder %s101_s23, %s101_s23 }
  0x3a   :  { %p3800_p5 = scmp.ne.s32.totalorder %s101_s23, %s3799_s30  ;;  %p3805_p7 = scmp.lt.s32.totalorder %s3799_s30, %s3799_s30 }
  0x3c   :  { %p3806_p8 = por %p3805_p7, %p3804_p6 }
  0x3e   :  { %p3807_p9 = pnand %p3806_p8, %p3800_p5 }
  0x40   :  { %3810 = shalt.err (!%p3807_p9)
}
  0x41   :  { %106 = dma.hbm_to_vmem [thread:$0]  %s4868_s7, 512, %s101_s23, [#allocation12], %s3979_s0, %s3979_s0, %s3980_s21  }
  0x42   :  { %s3982_s22 = smov [#allocation14]   ;;  %s3983_s1 = smov [#allocation2]  }
  0x43   :  { %s124_s3 = sshll.u32 %s3982_s22, 4  ;;  %s40_s2 = sshll.u32 %s3983_s1, 4  ;;  %s125_s3 = int_to_ptr.vmem [resolvable:$true] %s124_s3  ;;  %s41_s2 = int_to_ptr.vmem [resolvable:$true] %s40_s2 }
  0x44   :  { %s3811_s27 = scalar_lea.hbm %s4870_s9, 512 }
  0x45   :  { %p3812_p10 = scmp.ne.s32.totalorder %s4870_s9, %s3811_s27  ;;  %p3815_p11 = scmp.lt.u32.totalorder %s3811_s27, %s4870_s9 }
  0x47   :  { %p3817_p12 = pnand %p3815_p11, %p3812_p10 }
  0x49   :  { %3820 = shalt.err (!%p3817_p12)
}
  0x4a   :  { %s3821_s7 = scalar_lea.vmem %s125_s3, 512  ;;  %p3826_p0 = scmp.lt.s32.totalorder %s125_s3, %s125_s3 }
  0x4b   :  { %p3822_p13 = scmp.ne.s32.totalorder %s125_s3, %s3821_s7  ;;  %p3827_p1 = scmp.lt.s32.totalorder %s3821_s7, %s3821_s7 }
  0x4d   :  { %p3828_p2 = por %p3827_p1, %p3826_p0 }
  0x4f   :  { %p3829_p3 = pnand %p3828_p2, %p3822_p13 }
  0x51   :  { %3832 = shalt.err (!%p3829_p3)
}
  0x52   :  { %s4887_s23 = smov 64   ;;  %s4889_s5 = smov 4  }
  0x53   :  { %130 = dma.hbm_to_vmem [thread:$0]  %s4870_s9, 512, %s125_s3, [#allocation15], %s4887_s23, %s4887_s23, %s4889_s5  }
  0x54   :  { %s4897_s26 = sld [smem:[#allocation26_spill]] }
  0x5a   :  { %s3833_s27 = scalar_lea.hbm %s4897_s26, 512 }
  0x5b   :  { %p3834_p4 = scmp.ne.s32.totalorder %s4897_s26, %s3833_s27  ;;  %p3837_p5 = scmp.lt.u32.totalorder %s3833_s27, %s4897_s26 }
  0x5d   :  { %p3839_p6 = pnand %p3837_p5, %p3834_p4 }
  0x5f   :  { %3842 = shalt.err (!%p3839_p6)
}
  0x60   :  { %s3843_s7 = scalar_lea.vmem %s41_s2, 512  ;;  %p3848_p8 = scmp.lt.s32.totalorder %s41_s2, %s41_s2 }
  0x61   :  { %p3844_p7 = scmp.ne.s32.totalorder %s41_s2, %s3843_s7  ;;  %p3849_p9 = scmp.lt.s32.totalorder %s3843_s7, %s3843_s7 }
  0x63   :  { %p3850_p10 = por %p3849_p9, %p3848_p8 }
  0x65   :  { %p3851_p11 = pnand %p3850_p10, %p3844_p7 }
  0x67   :  { %3854 = shalt.err (!%p3851_p11)
}
  0x68   :  { %46 = dma.hbm_to_vmem [thread:$0]  %s4897_s26, 512, %s41_s2, [#allocation3], %s3979_s0, %s3979_s0, %s3980_s21  }
  0x69   :  { %s3986_s24 = smov [#allocation7]   ;;  %s3987_s1 = smov [#allocation10]  }
  0x6a   :  { %s64_s22 = sshll.u32 %s3986_s24, 4  ;;  %s88_s25 = sshll.u32 %s3987_s1, 4  ;;  %s65_s22 = int_to_ptr.vmem [resolvable:$true] %s64_s22  ;;  %s89_s25 = int_to_ptr.vmem [resolvable:$true] %s88_s25 }
  0x6b   :  { %s4898_s4 = sld [smem:[#allocation28_spill]] }
  0x71   :  { %s3855_s29 = scalar_lea.hbm %s4898_s4, 512 }
  0x72   :  { %p3856_p12 = scmp.ne.s32.totalorder %s4898_s4, %s3855_s29  ;;  %p3859_p13 = scmp.lt.u32.totalorder %s3855_s29, %s4898_s4 }
  0x74   :  { %p3861_p0 = pnand %p3859_p13, %p3856_p12 }
  0x76   :  { %3864 = shalt.err (!%p3861_p0)
}
  0x77   :  { %s3865_s2 = scalar_lea.vmem %s65_s22, 512  ;;  %p3870_p2 = scmp.lt.s32.totalorder %s65_s22, %s65_s22 }
  0x78   :  { %p3866_p1 = scmp.ne.s32.totalorder %s65_s22, %s3865_s2  ;;  %p3871_p3 = scmp.lt.s32.totalorder %s3865_s2, %s3865_s2 }
  0x7a   :  { %p3872_p4 = por %p3871_p3, %p3870_p2 }
  0x7c   :  { %p3873_p5 = pnand %p3872_p4, %p3866_p1 }
  0x7e   :  { %3876 = shalt.err (!%p3873_p5)
}
  0x7f   :  { %70 = dma.hbm_to_vmem [thread:$0]  %s4898_s4, 512, %s65_s22, [#allocation6], %s3979_s0, %s3979_s0, %s3980_s21  }
  0x80   :  { %s3877_s5 = scalar_lea.hbm %s4867_s6, 512 }
  0x81   :  { %p3878_p6 = scmp.ne.s32.totalorder %s4867_s6, %s3877_s5  ;;  %p3881_p7 = scmp.lt.u32.totalorder %s3877_s5, %s4867_s6 }
  0x83   :  { %p3883_p8 = pnand %p3881_p7, %p3878_p6 }
  0x85   :  { %3886 = shalt.err (!%p3883_p8)
}
  0x86   :  { %s3887_s29 = scalar_lea.vmem %s89_s25, 512  ;;  %p3892_p10 = scmp.lt.s32.totalorder %s89_s25, %s89_s25 }
  0x87   :  { %p3888_p9 = scmp.ne.s32.totalorder %s89_s25, %s3887_s29  ;;  %p3893_p11 = scmp.lt.s32.totalorder %s3887_s29, %s3887_s29 }
  0x89   :  { %p3894_p12 = por %p3893_p11, %p3892_p10 }
  0x8b   :  { %p3895_p13 = pnand %p3894_p12, %p3888_p9 }
  0x8d   :  { %3898 = shalt.err (!%p3895_p13)
}
  0x8e   :  { %94 = dma.hbm_to_vmem [thread:$0]  %s4867_s6, 512, %s89_s25, [#allocation9], %s3979_s0, %s3979_s0, %s3980_s21  }
  0x8f   :  { %s3988_s30 = smov [#allocation13]   ;;  %s3989_s2 = smov [#allocation16]  }
  0x90   :  { %s112_s7 = sshll.u32 %s3988_s30, 4  ;;  %s142_s26 = sshll.u32 %s3989_s2, 4  ;;  %s113_s7 = int_to_ptr.vmem [resolvable:$true] %s112_s7  ;;  %s143_s26 = int_to_ptr.vmem [resolvable:$true] %s142_s26 }
  0x91   :  { %s3899_s23 = scalar_lea.hbm %s4869_s8, 512 }
  0x92   :  { %p3900_p0 = scmp.ne.s32.totalorder %s4869_s8, %s3899_s23  ;;  %p3903_p1 = scmp.lt.u32.totalorder %s3899_s23, %s4869_s8 }
  0x94   :  { %p3905_p2 = pnand %p3903_p1, %p3900_p0 }
  0x96   :  { %3908 = shalt.err (!%p3905_p2)
}
  0x97   :  { %s3909_s6 = scalar_lea.vmem %s113_s7, 512  ;;  %p3914_p4 = scmp.lt.s32.totalorder %s113_s7, %s113_s7 }
  0x98   :  { %p3910_p3 = scmp.ne.s32.totalorder %s113_s7, %s3909_s6  ;;  %p3915_p5 = scmp.lt.s32.totalorder %s3909_s6, %s3909_s6 }
  0x9a   :  { %p3916_p6 = por %p3915_p5, %p3914_p4 }
  0x9c   :  { %p3917_p7 = pnand %p3916_p6, %p3910_p3 }
  0x9e   :  { %3920 = shalt.err (!%p3917_p7)
}
  0x9f   :  { %s4899_s25 = smov 4   ;;  %s4900_s28 = smov 64  }
  0xa0   :  { %118 = dma.hbm_to_vmem [thread:$0]  %s4869_s8, 512, %s113_s7, [#allocation12], %s4900_s28, %s4900_s28, %s4899_s25  }
  0xa1   :  { %s3921_s2 = scalar_lea.hbm %s4874_s13, 512 }
  0xa2   :  { %p3922_p8 = scmp.ne.s32.totalorder %s4874_s13, %s3921_s2  ;;  %p3925_p9 = scmp.lt.u32.totalorder %s3921_s2, %s4874_s13 }
  0xa4   :  { %p3927_p10 = pnand %p3925_p9, %p3922_p8 }
  0xa6   :  { %3930 = shalt.err (!%p3927_p10)
}
  0xa7   :  { %s3931_s24 = scalar_lea.vmem %s143_s26, 512  ;;  %p3936_p12 = scmp.lt.s32.totalorder %s143_s26, %s143_s26 }
  0xa8   :  { %p3932_p11 = scmp.ne.s32.totalorder %s143_s26, %s3931_s24  ;;  %p3937_p13 = scmp.lt.s32.totalorder %s3931_s24, %s3931_s24 }
  0xaa   :  { %p3938_p0 = por %p3937_p13, %p3936_p12 }
  0xac   :  { %p3939_p1 = pnand %p3938_p0, %p3932_p11 }
  0xae   :  { %3942 = shalt.err (!%p3939_p1)
}
  0xaf   :  { %148 = dma.hbm_to_vmem [thread:$0]  %s4874_s13, 512, %s143_s26, [#allocation15], %s4900_s28, %s4900_s28, %s4899_s25  }
  0xb0   :  { %3965 = dma.done.wait [#allocation3], 512  }
  0xb1   :  { %3966 = vsyncadd [#allocation3], 4294966784 }
  0xb2   :  { %3967 = dma.done.wait [#allocation6], 1024  }
  0xb3   :  { %3968 = vsyncadd [#allocation6], 4294966272 }
  0xb4   :  { %3969 = dma.done.wait [#allocation9], 1024  }
  0xb5   :  { %3970 = vsyncadd [#allocation9], 4294966272 }
  0xb6   :  { %3971 = dma.done.wait [#allocation12], 1024  }
  0xb7   :  { %3972 = vsyncadd [#allocation12], 4294966272 }
  0xb8   :  { %3973 = dma.done.wait [#allocation15], 1024  }
  0xb9   :  { %3974 = vsyncadd [#allocation15], 4294966272  ;;  %s4901_s6 = sld [smem:[#allocation24_spill]]  ;;  %vm198_vm0 = vcmask 523264   ;;  %v3545_v12 = vld [vmem:[#allocation13] sm:$0xff]   ;;  %v3546_v13 = vld [vmem:[#allocation13 + $0x8] sm:$0xff]  }
  0xba   :  { %3198 = vmatprep.subr.bf16.mxu0 %v3545_v12  ;;  %v3547_v14 = vld [vmem:[#allocation13 + $0x10] sm:$0xff]   ;;  %v3548_v15 = vld [vmem:[#allocation13 + $0x18] sm:$0xff]   ;;  %v339_v16 = vld [vmem:[%s4873_s12] sm:$0xff]  ;;  %vm475_vm1 = vcmask 261120   ;;  %vm848_vm2 = vcmask 130048   ;;  %s3991_s9 = smov 96  }
  0xbb   :  { %3199 = vmatpush3.bf16.msra.mxu0 %v3545_v12  ;;  %v340_v17 = vld [vmem:[%s4873_s12 + $0x8] sm:$0xff]  ;;  %v341_v18 = vld [vmem:[%s4873_s12 + $0x10] sm:$0xff]  ;;  %v342_v20 = vld [vmem:[%s4873_s12 + $0x18] sm:$0xff]  ;;  %s3992_s3 = smov 48   ;;  %s4904_s24 = sld [smem:[#allocation25_spill]]  ;;  %vm3997_vm6 = vmmov 0  }
  0xbc   :  { %3200 = vmatprep.subr.bf16.mxu0 %v3546_v13  ;;  %v3394_v19 = vpack.c.bf16 %v340_v17, %v339_v16  ;;  %v3398_v21 = vpack.c.bf16 %v342_v20, %v341_v18  ;;  %v343_v22 = vld [vmem:[%s4873_s12 + $0x20] sm:$0xff]  ;;  %v344_v23 = vld [vmem:[%s4873_s12 + $0x28] sm:$0xff]  ;;  %v240_v42 = vld [vmem:[#allocation7 + $0x10] sm:$0xff]  ;;  %s3994_s8 = smov 16  }
  0xbd   :  { %v3402_v24 = vpack.c.bf16 %v344_v23, %v343_v22  ;;  %v2946_v40 = vld [vmem:[%s4875_s14] ss:$0 sm:$0xff]  ;;  %v241_v43 = vld [vmem:[#allocation7 + $0x18] sm:$0xff]  ;;  %v239_v45 = vld [vmem:[#allocation7 + $0x8] sm:$0xff]  ;;  %v244_v50 = vadd.f32 1.0, %v240_v42 }
  0xbe   :  { %3395 = vmatprep.subr.bf16.mxu1 %v3394_v19  ;;  %v238_v44 = vld [vmem:[#allocation7] sm:$0xff]  ;;  %v245_v51 = vadd.f32 1.0, %v241_v43  ;;  %v243_v55 = vadd.f32 1.0, %v239_v45  ;;  %v3552_v16 = vld [vmem:[#allocation16 + $0x18] sm:$0xff]   ;;  %vm4427_vm3 = vmpackc.low %vm848_vm2, %vm848_vm2 }
  0xbf   :  { %v4250_v0 = vld [vmem:[%s4901_s6 + $0x10] sm:$0xff]  ;;  %v4255_v1 = vld [vmem:[%s4901_s6] sm:$0xff]  ;;  %v4260_v2 = vld [vmem:[%s4901_s6 + $0x18] sm:$0xff]  ;;  %3201 = vmatpush3.bf16.msra.mxu0 %v3546_v13  ;;  %3397 = vmatpush3.bf16.msra.mxu1 %v3394_v19  ;;  %v242_v54 = vadd.f32 1.0, %v238_v44 }
  0xc0   :  { %v196_v3 = vmul.f32 %v4250_v0, %v4250_v0  ;;  %v194_v4 = vmul.f32 %v4255_v1, %v4255_v1  ;;  %v197_v5 = vmul.f32 %v4260_v2, %v4260_v2  ;;  %v4271_v6 = vld [vmem:[%s4901_s6 + $0x8] sm:$0xff]  ;;  %3202 = vmatprep.subr.bf16.mxu0 %v3547_v14  ;;  %3399 = vmatprep.subr.bf16.mxu1 %v3398_v21  ;;  %v3549_v13 = vld [vmem:[#allocation16] sm:$0xff]  }
  0xc1   :  { %v195_v7 = vmul.f32 %v4271_v6, %v4271_v6 }
  0xc2   :  { %v205_v8 = vsel %vm198_vm0, %v196_v3, 0.0  ;;  %v199_v9 = vsel %vm198_vm0, %v194_v4, 0.0  ;;  %v208_v10 = vsel %vm198_vm0, %v197_v5, 0.0 }
  0xc3   :  { %206 = vadd.xlane.f32.xlu1 %v205_v8  ;;  %200 = vadd.xlane.f32.xlu0 %v199_v9  ;;  %v202_v11 = vsel %vm198_vm0, %v195_v7, 0.0 }
  0xc4   :  { %3203 = vmatpush3.bf16.msra.mxu0 %v3547_v14  ;;  %3401 = vmatpush3.bf16.msra.mxu1 %v3398_v21  ;;  %v3550_v14 = vld [vmem:[#allocation16 + $0x8] sm:$0xff]  }
  0xc5   :  { %3204 = vmatprep.subr.bf16.mxu0 %v3548_v15  ;;  %3403 = vmatprep.subr.bf16.mxu1 %v3402_v24 }
  0xc7   :  { %209 = vadd.xlane.f32.xlu1 %v208_v10  ;;  %203 = vadd.xlane.f32.xlu0 %v202_v11 }
  0xc8   :  { %3205 = vmatpush3.bf16.msra.mxu0 %v3548_v15  ;;  %3405 = vmatpush3.bf16.msra.mxu1 %v3402_v24  ;;  %v3551_v15 = vld [vmem:[#allocation16 + $0x10] sm:$0xff]  }
  0xc9   :  { %3411 = vmatprep.subr.bf16.mxu0 %v3394_v19 }
 0x150   :  { %v207_v25 = vpop.xlane.xlu1 %206  ;;  %v201_v26 = vpop.xlane.xlu0 %200 }
 0x151   :  { %v214_v27 = vmul.f32 0.015625, %v207_v25  ;;  %v212_v28 = vmul.f32 0.015625, %v201_v26 }
 0x153   :  { %v218_v29 = vadd.f32 1e-05, %v214_v27  ;;  %v216_v30 = vadd.f32 1e-05, %v212_v28 }
 0x154   :  { %v210_v31 = vpop.xlane.xlu1 %209  ;;  %v204_v32 = vpop.xlane.xlu0 %203 }
 0x155   :  { %3597 = vrsqrt.f32 %v218_v29  ;;  %v215_v33 = vmul.f32 0.015625, %v210_v31  ;;  %v213_v34 = vmul.f32 0.015625, %v204_v32 }
 0x156   :  { %3599 = vrsqrt.f32 %v216_v30  ;;  %v2957_v30 = vld [vmem:[%s4879_s18] ss:$0 sm:$0xff] }
 0x157   :  { %v219_v35 = vadd.f32 1e-05, %v215_v33  ;;  %v217_v36 = vadd.f32 1e-05, %v213_v34 }
 0x159   :  { %3601 = vrsqrt.f32 %v219_v35 }
 0x15a   :  { %3603 = vrsqrt.f32 %v217_v36 }
 0x15f   :  { %v3598_v37 = vpop.eup %3597 }
 0x160   :  { %v3600_v38 = vpop.eup %3599  ;;  %v226_v39 = vmul.f32 %v3598_v37, %v4250_v0  ;;  %v345_v0 = vld [vmem:[%s4873_s12 + $0x30] sm:$0xff] }
 0x161   :  { %v224_v41 = vmul.f32 %v3600_v38, %v4255_v1  ;;  %v346_v1 = vld [vmem:[%s4873_s12 + $0x38] sm:$0xff] }
 0x162   :  { %v236_v49 = vmul.f32 %v2946_v40, %v226_v39 }
 0x163   :  { %v3602_v46 = vpop.eup %3601  ;;  %v234_v53 = vmul.f32 %v2946_v40, %v224_v41 }
 0x164   :  { %v3604_v47 = vpop.eup %3603  ;;  %v227_v48 = vmul.f32 %v3602_v46, %v4260_v2  ;;  %v248_v58 = vmul.f32 %v244_v50, %v236_v49  ;;  %v3406_v2 = vpack.c.bf16 %v346_v1, %v345_v0 }
 0x165   :  { %v225_v52 = vmul.f32 %v3604_v47, %v4271_v6  ;;  %v246_v60 = vmul.f32 %v242_v54, %v234_v53 }
 0x166   :  { %v237_v56 = vmul.f32 %v2946_v40, %v227_v48  ;;  %3407 = vmatprep.subr.bf16.mxu1 %v3406_v2 }
 0x167   :  { %v235_v57 = vmul.f32 %v2946_v40, %v225_v52  ;;  %3409 = vmatpush3.bf16.msra.mxu1 %v3406_v2  ;;  %v611_v2 = vld [vmem:[#allocation5 + $0x8] sm:$0xff] }
 0x168   :  { %v249_v59 = vmul.f32 %v245_v51, %v237_v56  ;;  %3246 = vmatprep.subr.bf16.mxu1 %v3549_v13  ;;  %v2962_v56 = vld [vmem:[%s4880_s19] ss:$0 sm:$0xff]  ;;  %s3990_s19 = smov 112  }
 0x169   :  { %v247_v61 = vmul.f32 %v243_v55, %v235_v57  ;;  %v4365_v57 = vld [vmem:[#allocation5 + $0x10] sm:$0xff] }
 0x16a   :  { %v259_v62 = vpack.c.bf16 %v249_v59, %v248_v58  ;;  %v4367_v58 = vld [vmem:[#allocation2 + $0x10] sm:$0xff]  ;;  %v610_v59 = vld [vmem:[#allocation5] sm:$0xff] }
 0x16b   :  { %v258_v63 = vpack.c.bf16 %v247_v61, %v246_v60  ;;  %v606_v60 = vld [vmem:[#allocation2] sm:$0xff] }
 0x16d   :  { %3206 = vmatprep.mubr.msk.bf16.mxu0 %vm198_vm0, %v258_v63  ;;  %v4371_v63 = vld [vmem:[#allocation2 + $0x18] sm:$0xff] }
 0x16e   :  { %3207 = vmatmul.mubr.msk.bf16.vlgmr.msra.gmra.mrb[0].mxu0 %vm198_vm0, %v259_v62  ;;  %v4369_v62 = vld [vmem:[#allocation5 + $0x18] sm:$0xff] }
 0x16f   :  { %3413 = vmatpush3.bf16.msra.mxu0 %v3394_v19 }
 0x170   :  { %3415 = vmatprep.subr.bf16.mxu0 %v3398_v21 }
 0x173   :  { %3417 = vmatpush3.bf16.msra.mxu0 %v3398_v21 }
 0x174   :  { %3258 = vmatprep.subr.bf16.mxu0 %v3549_v13 }
 0x241   :  { %v4312_v3 = vpop.f32.mrb[0].mxu0 }
 0x242   :  { %v4314_v4 = vpop.f32.mrb[1].mxu0  ;;  %v349_v5 = vmul.f32 %v4312_v3, %v4312_v3 }
 0x243   :  { %v4318_v6 = vpop.f32.mrb[2].mxu0  ;;  %v347_v7 = vmul.f32 %v4314_v4, %v4314_v4 }
 0x244   :  { %471 = vrot.lane.b32.xlu1 %v349_v5, %s4900_s28  ;;  %v4323_v8 = vpop.f32.mrb[3].mxu0  ;;  %v4327_v9 = vpack.i.bf16 %v4318_v6, %v4312_v3  ;;  %v350_v12 = vmul.f32 %v4318_v6, %v4318_v6 }
 0x245   :  { %467 = vrot.lane.b32.xlu0 %v347_v7, %s4900_s28  ;;  %3226 = vmatprep.mubr.msk.f32.mxu1 %vm198_vm0, %v347_v7  ;;  %v348_v10 = vmul.f32 %v4323_v8, %v4323_v8  ;;  %v4335_v11 = vpack.i.bf16 %v4323_v8, %v4314_v4 }
 0x247   :  { %3227 = vmatmul.mubr.msk.f32.vlgmr.msra.gmra.mrb[0].mxu1 %vm198_vm0, %v348_v10 }
 0x248   :  { %469 = vrot.lane.b32.xlu1 %v348_v10, %s4900_s28  ;;  %3229 = vmatprep.mubr.msk.f32.mxu1 %vm198_vm0, %v349_v5  ;;  %v607_v5 = vld [vmem:[#allocation2 + $0x8] sm:$0xff] }
 0x249   :  { %3247 = vmatpush3.bf16.msra.mxu1 %v3549_v13 }
 0x24a   :  { %3248 = vmatprep.subr.bf16.mxu1 %v3550_v14 }
 0x24b   :  { %3230 = vmatmul.mubr.msk.f32.gmra.mrb[2].mxu1 %vm198_vm0, %v350_v12 }
 0x24c   :  { %473 = vrot.lane.b32.xlu1 %v350_v12, %s4900_s28 }
 0x24d   :  { %3249 = vmatpush3.bf16.msra.mxu1 %v3550_v14 }
 0x24e   :  { %3250 = vmatprep.subr.bf16.mxu1 %v3551_v15 }
 0x251   :  { %3251 = vmatpush3.bf16.msra.mxu1 %v3551_v15 }
 0x252   :  { %3252 = vmatprep.subr.bf16.mxu1 %v3552_v16 }
 0x255   :  { %3253 = vmatpush3.bf16.msra.mxu1 %v3552_v16 }
 0x2b6   :  { %v472_v17 = vpop.permute.xlu1 %471 }
 0x2b7   :  { %v468_v18 = vpop.permute.xlu0 %467 }
 0x2b8   :  { %3240 = vmatprep.mubr.msk.f32.mxu0 %vm475_vm1, %v468_v18 }
 0x2ba   :  { %v470_v19 = vpop.permute.xlu1 %469 }
 0x2bb   :  { %3241 = vmatmul.mubr.msk.f32.vlgmr.msra.gmra.mrb[4].mxu0 %vm475_vm1, %v470_v19 }
 0x2bc   :  { %3243 = vmatprep.mubr.msk.f32.mxu0 %vm475_vm1, %v472_v17  ;;  %3259 = vmatpush3.bf16.msra.mxu0 %v3549_v13 }
 0x2bd   :  { %3260 = vmatprep.subr.bf16.mxu0 %v3550_v14 }
 0x2be   :  { %v474_v20 = vpop.permute.xlu1 %473 }
 0x2bf   :  { %3244 = vmatmul.mubr.msk.f32.gmra.mrb[6].mxu0 %vm475_vm1, %v474_v20 }
 0x2c0   :  { %3261 = vmatpush3.bf16.msra.mxu0 %v3550_v14 }
 0x31a   :  { %v3228_v21 = vpop.f32.mrb[0].mxu1 }
 0x31b   :  { %v435_v22 = vadd.f32 1e-06, %v3228_v21  ;;  %v429_v23 = vpop.f32.mrb[1].mxu1 }
 0x31c   :  { %v430_v24 = vadd.f32 1e-06, %v429_v23 }
 0x31d   :  { %3605 = vrsqrt.f32 %v435_v22 }
 0x31e   :  { %3607 = vrsqrt.f32 %v430_v24  ;;  %v3231_v25 = vpop.f32.mrb[2].mxu1 }
 0x31f   :  { %v445_v26 = vadd.f32 1e-06, %v3231_v25  ;;  %v439_v27 = vpop.f32.mrb[3].mxu1 }
 0x320   :  { %v440_v28 = vadd.f32 1e-06, %v439_v27 }
 0x321   :  { %3609 = vrsqrt.f32 %v445_v26 }
 0x322   :  { %3611 = vrsqrt.f32 %v440_v28 }
 0x327   :  { %v3606_v29 = vpop.eup %3605 }
 0x328   :  { %v3608_v31 = vpop.eup %3607  ;;  %v453_v32 = vmul.f32 %v3606_v29, %v4323_v8 }
 0x329   :  { %v452_v33 = vmul.f32 %v3608_v31, %v4314_v4 }
 0x32a   :  { %v464_v34 = vmul.f32 %v2957_v30, %v453_v32 }
 0x32b   :  { %v3610_v35 = vpop.eup %3609  ;;  %v463_v36 = vmul.f32 %v2957_v30, %v452_v33 }
 0x32c   :  { %v3612_v37 = vpop.eup %3611  ;;  %v455_v38 = vmul.f32 %v3610_v35, %v4318_v6  ;;  %v623_v20 = vmul.f32 %v607_v5, %v464_v34 }
 0x32d   :  { %v454_v39 = vmul.f32 %v3612_v37, %v4312_v3  ;;  %v626_v40 = vpack.c.bf16 %v464_v34, %v463_v36  ;;  %v622_v13 = vmul.f32 %v606_v60, %v463_v36 }
 0x32e   :  { %v466_v41 = vmul.f32 %v2957_v30, %v455_v38 }
 0x32f   :  { %v465_v42 = vmul.f32 %v2957_v30, %v454_v39  ;;  %3254 = vmatprep.mubr.msk.bf16.mxu1 %vm198_vm0, %v626_v40 }
 0x330   :  { %v625_v16 = vmul.f32 %v4371_v63, %v466_v41 }
 0x331   :  { %v627_v43 = vpack.c.bf16 %v466_v41, %v465_v42  ;;  %v624_v7 = vmul.f32 %v4367_v58, %v465_v42 }
 0x333   :  { %3255 = vmatmul.mubr.msk.bf16.vlgmr.msra.gmra.mrb[4].mxu1 %vm198_vm0, %v627_v43 }
 0x38e   :  { %v3242_v44 = vpop.f32.mrb[4].mxu0 }
 0x38f   :  { %v556_v45 = vadd.f32 1e-06, %v3242_v44  ;;  %v550_v46 = vpop.f32.mrb[5].mxu0 }
 0x390   :  { %v551_v47 = vadd.f32 1e-06, %v550_v46 }
 0x391   :  { %3613 = vrsqrt.f32 %v556_v45 }
 0x392   :  { %3615 = vrsqrt.f32 %v551_v47  ;;  %v3245_v48 = vpop.f32.mrb[6].mxu0 }
 0x393   :  { %v566_v49 = vadd.f32 1e-06, %v3245_v48  ;;  %v560_v50 = vpop.f32.mrb[7].mxu0 }
 0x394   :  { %v561_v51 = vadd.f32 1e-06, %v560_v50 }
 0x395   :  { %3617 = vrsqrt.f32 %v566_v49 }
 0x396   :  { %3619 = vrsqrt.f32 %v561_v51 }
 0x39b   :  { %v3614_v52 = vpop.eup %3613 }
 0x39c   :  { %v3616_v53 = vpop.eup %3615  ;;  %579 = vrot.lane.b32.xlu1 %v3614_v52, %s4900_s28 }
 0x39d   :  { %577 = vrot.lane.b32.xlu0 %v3616_v53, %s4900_s28 }
 0x39f   :  { %v3618_v54 = vpop.eup %3617 }
 0x3a0   :  { %v3620_v55 = vpop.eup %3619  ;;  %583 = vrot.lane.b32.xlu1 %v3618_v54, %s4900_s28 }
 0x3a1   :  { %581 = vrot.lane.b32.xlu0 %v3620_v55, %s4900_s28 }
 0x3a5   :  { %599 = vrot.lane.b32.xlu0 %v2962_v56, %s4900_s28 }
 0x406   :  { %v3256_v61 = vpop.f32.mrb[4].mxu1 }
 0x407   :  { %v709_v0 = vmul.f32 %v3256_v61, %v4365_v57  ;;  %v692_v1 = vpop.f32.mrb[5].mxu1 }
 0x408   :  { %v707_v10 = vmul.f32 %v692_v1, %v610_v59  ;;  %v3257_v12 = vpop.f32.mrb[6].mxu1 }
 0x409   :  { %v710_v14 = vmul.f32 %v3257_v12, %v4369_v62  ;;  %v695_v15 = vpop.f32.mrb[7].mxu1  ;;  %v4377_v17 = vadd.f32 %v709_v0, %v624_v7  ;;  %v3993_v12 = vmov -1e+30  }
 0x40a   :  { %v708_v18 = vmul.f32 %v695_v15, %v611_v2  ;;  %v711_v19 = vadd.f32 %v707_v10, %v622_v13 }
 0x40b   :  { %v4379_v21 = vadd.f32 %v710_v14, %v625_v16 }
 0x40c   :  { %v4381_v22 = vadd.f32 %v708_v18, %v623_v20 }
 0x40e   :  { %v580_v23 = vpop.permute.xlu1 %579 }
 0x40f   :  { %v578_v24 = vpop.permute.xlu0 %577  ;;  %v590_v27 = vmul.f32 %v580_v23, %v4323_v8 }
 0x410   :  { %v589_v28 = vmul.f32 %v578_v24, %v4314_v4 }
 0x412   :  { %v584_v25 = vpop.permute.xlu1 %583 }
 0x413   :  { %v582_v26 = vpop.permute.xlu0 %581  ;;  %v592_v29 = vmul.f32 %v4318_v6, %v584_v25 }
 0x414   :  { %v591_v30 = vmul.f32 %v4312_v3, %v582_v26 }
 0x417   :  { %v600_v31 = vpop.permute.xlu0 %599 }
 0x418   :  { %v602_v32 = vmul.f32 %v600_v31, %v589_v28  ;;  %v603_v33 = vmul.f32 %v600_v31, %v590_v27  ;;  %v4387_v34 = vmul.f32 %v600_v31, %v591_v30  ;;  %v4389_v35 = vmul.f32 %v600_v31, %v592_v29 }
 0x41a   :  { %v735_v36 = vpack.c.bf16 %v603_v33, %v602_v32  ;;  %v736_v37 = vpack.c.bf16 %v4389_v35, %v4387_v34 }
 0x41c   :  { %739 = vrot.lane.b32.xlu1 %v735_v36, %s4900_s28  ;;  %741 = vrot.lane.b32.xlu0 %v736_v37, %s4900_s28 }
 0x420   :  { %719 = vrot.lane.b32.xlu1 %v606_v60, %s4900_s28  ;;  %721 = vrot.lane.b32.xlu0 %v607_v5, %s4900_s28  ;;  %v822_v5 = vld [vmem:[%s4904_s24] sm:$0x1] }
 0x421   :  { %vm824_vm4 = vcmp.gt.f32.partialorder %v822_v5, 0.0 }
 0x422   :  { %v826_v13 = vsel %vm824_vm4, 0.0, %v3993_v12 }
 0x48e   :  { %v742_v3 = vpop.permute.xlu0 %741  ;;  %v740_v4 = vpop.permute.xlu1 %739 }
 0x48f   :  { %3262 = vmatprep.mubr.msk.bf16.mxu0 %vm475_vm1, %v740_v4 }
 0x490   :  { %3263 = vmatmul.mubr.msk.bf16.vlgmr.msra.gmra.mrb[8].mxu0 %vm475_vm1, %v742_v3 }
 0x491   :  { %3270 = vmatprep.mubr.msk.f32.mxu0 %vm848_vm2, %v711_v19 }
 0x492   :  { %v720_v42 = vpop.permute.xlu1 %719  ;;  %v722_v43 = vpop.permute.xlu0 %721 }
 0x493   :  { %v732_v45 = vmul.f32 %v722_v43, %v603_v33  ;;  %v731_v46 = vmul.f32 %v720_v42, %v602_v32 }
 0x563   :  { %v4400_v6 = vpop.f32.mrb[8].mxu0 }
 0x564   :  { %v783_v8 = vpop.f32.mrb[9].mxu0  ;;  %v800_v36 = vmul.f32 %v4400_v6, %v4365_v57 }
 0x565   :  { %v798_v38 = vmul.f32 %v783_v8, %v610_v59  ;;  %v4402_v39 = vpop.f32.mrb[10].mxu0 }
 0x566   :  { %v786_v40 = vpop.f32.mrb[11].mxu0  ;;  %v801_v37 = vmul.f32 %v4402_v39, %v4369_v62 }
 0x567   :  { %v799_v41 = vmul.f32 %v786_v40, %v611_v2  ;;  %806 = vrot.lane.b32.xlu1 %v798_v38, %s4900_s28  ;;  %v951_v2 = vlaneseq }
 0x569   :  { %808 = vrot.lane.b32.xlu0 %v799_v41, %s4900_s28  ;;  %v4441_v7 = vshrl.u32 %v951_v2, 7 }
 0x56b   :  { %838 = vrot.lane.b32.xlu1 %v711_v19, %s3990_s19  ;;  %v953_v10 = vsub.s32 0, %v4441_v7 }
 0x56d   :  { %840 = vrot.lane.b32.xlu0 %v4381_v22, %s3990_s19  ;;  %v4447_v14 = vrot.slane %v826_v13, %v953_v10 }
 0x571   :  { %1211 = vrot.lane.b32.xlu0 %v711_v19, %s3991_s9 }
 0x5d9   :  { %v807_v44 = vpop.permute.xlu1 %806 }
 0x5da   :  { %v818_v48 = vadd.f32 %v807_v44, %v731_v46 }
 0x5db   :  { %v809_v47 = vpop.permute.xlu0 %808 }
 0x5dc   :  { %v819_v49 = vadd.f32 %v809_v47, %v732_v45 }
 0x5dd   :  { %v4410_v50 = vpop.permute.xlu1 %838 }
 0x5de   :  { %v4412_v51 = vpack.i.bf16 %v819_v49, %v818_v48  ;;  %1215 = vrot.lane.b32.xlu0 %v4410_v50, %s3991_s9 }
 0x5df   :  { %v4416_v52 = vpop.permute.xlu0 %840 }
 0x5e0   :  { %3506 = vrot.lane.b32.xlu1 %v4412_v51, %s3992_s3 }
 0x5e3   :  { %v1212_v53 = vpop.permute.xlu0 %1211 }
 0x5e4   :  { %3302 = vmatprep.mubr.msk.f32.mxu1 %vm848_vm2, %v1212_v53  ;;  %1213 = vrot.lane.b32.xlu1 %v4381_v22, %s3991_s9 }
 0x5e8   :  { %1217 = vrot.lane.b32.xlu1 %v4416_v52, %s3991_s9 }
 0x650   :  { %v1216_v0 = vpop.permute.xlu0 %1215 }
 0x652   :  { %v3507_v54 = vpop.permute.xlu1 %3506 }
 0x653   :  { %v3509_v55 = vunpack.i.h.bf16 %v3507_v54  ;;  %v3508_v56 = vunpack.i.l.bf16 %v3507_v54 }
 0x655   :  { %v3428_v60 = vpack.c.bf16 %v3509_v55, %v3508_v56 }
 0x656   :  { %v1214_v61 = vpop.permute.xlu1 %1213 }
 0x657   :  { %3430 = vmatprep.subr.msk.bf16.mxu1 %vm4427_vm3, %v3428_v60 }
 0x658   :  { %3433 = vmatpush3.bf16.xpose.msk.msra.mxu1 %vm4427_vm3, %v3428_v60 }
 0x65a   :  { %v1218_v1 = vpop.permute.xlu1 %1217 }
 0x65f   :  { %3303 = vmatmul.mubr.msk.f32.vlgmr.msra.gmra.mrb[8].mxu1 %vm848_vm2, %v1214_v61 }
 0x660   :  { %3305 = vmatprep.mubr.msk.f32.mxu1 %vm848_vm2, %v1216_v0 }
 0x663   :  { %3306 = vmatmul.mubr.msk.f32.gmra.mrb[10].mxu1 %vm848_vm2, %v1218_v1 }
 0x732   :  { %v3304_v15 = vpop.f32.mrb[8].mxu1 }
 0x733   :  { %v1321_v16 = vmul.f32 0.25, %v3304_v15  ;;  %v1301_v18 = vpop.f32.mrb[9].mxu1 }
 0x734   :  { %v1320_v19 = vmul.f32 0.25, %v1301_v18 }
 0x735   :  { %v1325_v20 = vadd.f32 %v1321_v16, %v4447_v14 }
 0x736   :  { %v3307_v23 = vpop.f32.mrb[10].mxu1  ;;  %v1324_v24 = vadd.f32 %v1320_v19, %v4447_v14 }
 0x737   :  { %v1311_v25 = vpop.f32.mrb[11].mxu1  ;;  %v1331_v26 = vsel %vm848_vm2, %v1325_v20, -inf  ;;  %v1323_v27 = vmul.f32 0.25, %v3307_v23 }
 0x738   :  { %v1322_v28 = vmul.f32 0.25, %v1311_v25  ;;  %1332 = vmax.xlane.f32.xlu1 %v1331_v26  ;;  %v1328_v29 = vsel %vm848_vm2, %v1324_v24, -inf }
 0x739   :  { %1329 = vmax.xlane.f32.xlu0 %v1328_v29  ;;  %v1327_v32 = vadd.f32 %v1323_v27, %v4447_v14 }
 0x73a   :  { %v1326_v30 = vadd.f32 %v1322_v28, %v4447_v14 }
 0x73b   :  { %v1337_v33 = vsel %vm848_vm2, %v1327_v32, -inf }
 0x73c   :  { %v1334_v31 = vsel %vm848_vm2, %v1326_v30, -inf }
 0x73d   :  { %1335 = vmax.xlane.f32.xlu0 %v1334_v31 }
 0x741   :  { %1338 = vmax.xlane.f32.xlu0 %v1337_v33 }
 0x749   :  { %725 = vrot.lane.b32.xlu1 %v4371_v63, %s4900_s28 }
 0x74d   :  { %810 = vrot.lane.b32.xlu1 %v800_v36, %s4900_s28 }
 0x751   :  { %812 = vrot.lane.b32.xlu1 %v801_v37, %s4900_s28 }
 0x757   :  { %723 = vrot.lane.b32.xlu0 %v4367_v58, %s4900_s28 }
 0x7c5   :  { %v1333_v3 = vpop.xlane.xlu1 %1332 }
 0x7c6   :  { %v1341_v4 = vsub.f32 %v1325_v20, %v1333_v3  ;;  %v1330_v8 = vpop.xlane.xlu0 %1329 }
 0x7c7   :  { %v1340_v38 = vsub.f32 %v1324_v24, %v1330_v8 }
 0x7c8   :  { %v1346_v40 = vmul.f32 1.442695, %v1341_v4 }
 0x7c9   :  { %v1344_v41 = vmul.f32 1.442695, %v1340_v38  ;;  %v726_v63 = vpop.permute.xlu1 %725  ;;  %v823_v38 = vld [vmem:[%s4904_s24 + $0x1] sm:$0x1] }
 0x7ca   :  { %3621 = vpow2.f32 %v1346_v40  ;;  %v1336_v42 = vpop.xlane.xlu0 %1335  ;;  %v734_v58 = vmul.f32 %v726_v63, %v4389_v35  ;;  %vm825_vm5 = vcmp.gt.f32.partialorder %v823_v38, 0.0 }
 0x7cb   :  { %3623 = vpow2.f32 %v1344_v41  ;;  %v1342_v57 = vsub.f32 %v1326_v30, %v1336_v42  ;;  %v827_v42 = vsel %vm825_vm5, 0.0, %v3993_v12 }
 0x7cd   :  { %v811_v6 = vpop.permute.xlu1 %810  ;;  %v1348_v62 = vmul.f32 1.442695, %v1342_v57  ;;  %v4518_v57 = vrot.slane %v827_v42, %v953_v10 }
 0x7ce   :  { %v1339_v43 = vpop.xlane.xlu0 %1338 }
 0x7cf   :  { %v1343_v44 = vsub.f32 %v1327_v32, %v1339_v43 }
 0x7d1   :  { %v1350_v39 = vmul.f32 1.442695, %v1343_v44  ;;  %v813_v45 = vpop.permute.xlu1 %812 }
 0x7d2   :  { %v724_v46 = vpop.permute.xlu0 %723  ;;  %v821_v53 = vadd.f32 %v813_v45, %v734_v58 }
 0x7d3   :  { %3625 = vpow2.f32 %v1350_v39  ;;  %v733_v47 = vmul.f32 %v724_v46, %v4387_v34 }
 0x7d4   :  { %v3622_v48 = vpop.eup %3621  ;;  %3627 = vpow2.f32 %v1348_v62 }
 0x7d5   :  { %v3624_v49 = vpop.eup %3623  ;;  %v820_v54 = vadd.f32 %v811_v6, %v733_v47  ;;  %v1355_v55 = vsel %vm848_vm2, %v3622_v48, 0.0 }
 0x7d6   :  { %1356 = vadd.xlane.f32.xlu1 %v1355_v55  ;;  %v1352_v56 = vsel %vm848_vm2, %v3624_v49, 0.0 }
 0x7d7   :  { %1353 = vadd.xlane.f32.xlu0 %v1352_v56  ;;  %v4471_v60 = vpack.i.bf16 %v821_v53, %v820_v54 }
 0x7dd   :  { %v3626_v61 = vpop.eup %3625 }
 0x7de   :  { %v1361_v0 = vsel %vm848_vm2, %v3626_v61, 0.0  ;;  %v3628_v35 = vpop.eup %3627 }
 0x7df   :  { %1362 = vadd.xlane.f32.xlu0 %v1361_v0  ;;  %v1358_v34 = vsel %vm848_vm2, %v3628_v35, 0.0 }
 0x7e3   :  { %1359 = vadd.xlane.f32.xlu0 %v1358_v34 }
 0x7e7   :  { %3516 = vrot.lane.b32.xlu1 %v4471_v60, %s4900_s28 }
 0x7eb   :  { %1583 = vrot.lane.b32.xlu1 %v4377_v17, %s3990_s19 }
 0x7ef   :  { %1585 = vrot.lane.b32.xlu1 %v4379_v21, %s3990_s19 }
 0x7f9   :  { %3511 = vrot.lane.b32.xlu0 %v4335_v11, %s3994_s8 }
 0x863   :  { %v1357_v2 = vpop.xlane.xlu1 %1356 }
 0x864   :  { %v1354_v1 = vpop.xlane.xlu0 %1353 }
 0x865   :  { %3629 = vrcp.f32 %v1354_v1 }
 0x866   :  { %3631 = vrcp.f32 %v1357_v2 }
 0x867   :  { %v3517_v18 = vpop.permute.xlu1 %3516 }
 0x868   :  { %v3519_v20 = vunpack.i.h.bf16 %v3517_v18  ;;  %v3518_v23 = vunpack.i.l.bf16 %v3517_v18 }
 0x86a   :  { %v3438_v28 = vpack.c.bf16 %v3519_v20, %v3518_v23 }
 0x86b   :  { %v4493_v36 = vpop.permute.xlu1 %1583 }
 0x86c   :  { %v1363_v5 = vpop.xlane.xlu0 %1362 }
 0x86f   :  { %v3630_v13 = vpop.eup %3629  ;;  %v1586_v37 = vpop.permute.xlu1 %1585 }
 0x870   :  { %v1360_v15 = vpop.xlane.xlu0 %1359  ;;  %v1368_v16 = vmul.f32 %v3630_v13, %v3624_v49  ;;  %v3632_v27 = vpop.eup %3631 }
 0x871   :  { %3633 = vrcp.f32 %v1360_v15  ;;  %v1369_v30 = vmul.f32 %v3632_v27, %v3622_v48 }
 0x872   :  { %3635 = vrcp.f32 %v1363_v5  ;;  %3312 = vmatprep.mubr.msk.f32.mxu1 %vm848_vm2, %v1368_v16 }
 0x874   :  { %v3512_v19 = vpop.permute.xlu0 %3511 }
 0x875   :  { %v3514_v24 = vunpack.i.h.bf16 %v3512_v19  ;;  %v3513_v25 = vunpack.i.l.bf16 %v3512_v19 }
 0x877   :  { %v3434_v26 = vpack.c.bf16 %v3514_v24, %v3513_v25 }
 0x879   :  { %3435 = vmatprep.subr.bf16.mxu1 %v3434_v26 }
 0x87a   :  { %3437 = vmatpush3.bf16.msra.mxu1 %v3434_v26 }
 0x87b   :  { %v3634_v29 = vpop.eup %3633  ;;  %3440 = vmatprep.subr.msk.bf16.mxu1 %vm4427_vm3, %v3438_v28 }
 0x87c   :  { %v3636_v31 = vpop.eup %3635  ;;  %v1370_v32 = vmul.f32 %v3634_v29, %v3628_v35 }
 0x87d   :  { %3313 = vmatmul.mubr.msk.f32.vlgmr.msra.gmra.mrb[12].mxu1 %vm848_vm2, %v1369_v30  ;;  %v1371_v33 = vmul.f32 %v3636_v31, %v3626_v61 }
 0x87e   :  { %3315 = vmatprep.mubr.msk.f32.mxu1 %vm848_vm2, %v1370_v32 }
 0x881   :  { %3316 = vmatmul.mubr.msk.f32.gmra.mrb[14].mxu1 %vm848_vm2, %v1371_v33 }
 0x882   :  { %3334 = vmatprep.mubr.msk.f32.mxu1 %vm848_vm2, %v4377_v17 }
 0x883   :  { %3443 = vmatpush3.bf16.xpose.msk.msra.mxu1 %vm4427_vm3, %v3438_v28 }
 0x88a   :  { %3335 = vmatmul.mubr.msk.f32.vlgmr.msra.gmra.mrb[16].mxu1 %vm848_vm2, %v4379_v21 }
 0x88b   :  { %3337 = vmatprep.mubr.msk.f32.mxu1 %vm848_vm2, %v4493_v36 }
 0x88e   :  { %3338 = vmatmul.mubr.msk.f32.gmra.mrb[18].mxu1 %vm848_vm2, %v1586_v37 }
 0x950   :  { %v4500_v3 = vpop.f32.mrb[12].mxu1 }
 0x951   :  { %v4502_v4 = vpop.f32.mrb[13].mxu1 }
 0x952   :  { %v1475_v8 = vpack.c.bf16 %v4500_v3, %v4502_v4 }
 0x954   :  { %v4509_v40 = vpop.f32.mrb[14].mxu1 }
 0x955   :  { %v4511_v41 = vpop.f32.mrb[15].mxu1 }
 0x956   :  { %v1528_v63 = vpack.c.bf16 %v4509_v40, %v4511_v41 }
 0x95d   :  { %v3336_v6 = vpop.f32.mrb[16].mxu1 }
 0x95e   :  { %v1691_v43 = vmul.f32 0.25, %v3336_v6  ;;  %v1671_v44 = vpop.f32.mrb[17].mxu1 }
 0x95f   :  { %v1690_v62 = vmul.f32 0.25, %v1671_v44 }
 0x960   :  { %v1701_v39 = vadd.f32 %v4518_v57, %v1691_v43 }
 0x961   :  { %v3339_v45 = vpop.f32.mrb[18].mxu1  ;;  %v1700_v46 = vadd.f32 %v4518_v57, %v1690_v62 }
 0x962   :  { %v1681_v58 = vpop.f32.mrb[19].mxu1  ;;  %v1707_v47 = vsel %vm848_vm2, %v1701_v39, -inf  ;;  %v1693_v48 = vmul.f32 0.25, %v3339_v45 }
 0x963   :  { %v1692_v49 = vmul.f32 0.25, %v1681_v58  ;;  %1708 = vmax.xlane.f32.xlu1 %v1707_v47  ;;  %v1704_v12 = vsel %vm848_vm2, %v1700_v46, -inf }
 0x964   :  { %1705 = vmax.xlane.f32.xlu0 %v1704_v12  ;;  %v1703_v53 = vadd.f32 %v4518_v57, %v1693_v48 }
 0x965   :  { %v1702_v7 = vadd.f32 %v4518_v57, %v1692_v49 }
 0x966   :  { %v1713_v54 = vsel %vm848_vm2, %v1703_v53, -inf }
 0x967   :  { %v1710_v10 = vsel %vm848_vm2, %v1702_v7, -inf }
 0x968   :  { %1711 = vmax.xlane.f32.xlu0 %v1710_v10 }
 0x96c   :  { %1714 = vmax.xlane.f32.xlu0 %v1713_v54 }
 0x982   :  { %3521 = vrot.lane.b32.xlu0 %v4412_v51, %s4900_s28  ;;  %s3995_s28 = smov 32  }
 0x986   :  { %3531 = vrot.lane.b32.xlu0 %v4471_v60, %s3992_s3 }
 0x98a   :  { %1943 = vrot.lane.b32.xlu0 %v4377_v17, %s3991_s9 }
 0x98e   :  { %1945 = vrot.lane.b32.xlu0 %v4379_v21, %s3991_s9 }
 0x992   :  { %1949 = vrot.lane.b32.xlu0 %v1586_v37, %s3991_s9 }
 0x9f0   :  { %v1709_v55 = vpop.xlane.xlu1 %1708 }
 0x9f1   :  { %v1717_v56 = vsub.f32 %v1701_v39, %v1709_v55  ;;  %v1706_v61 = vpop.xlane.xlu0 %1705 }
 0x9f2   :  { %v1716_v0 = vsub.f32 %v1700_v46, %v1706_v61 }
 0x9f3   :  { %v1722_v35 = vmul.f32 1.442695, %v1717_v56 }
 0x9f4   :  { %v1720_v34 = vmul.f32 1.442695, %v1716_v0 }
 0x9f5   :  { %3637 = vpow2.f32 %v1722_v35  ;;  %v1712_v1 = vpop.xlane.xlu0 %1711 }
 0x9f6   :  { %3639 = vpow2.f32 %v1720_v34  ;;  %v1718_v51 = vsub.f32 %v1702_v7, %v1712_v1 }
 0x9f8   :  { %v1724_v5 = vmul.f32 1.442695, %v1718_v51 }
 0x9f9   :  { %v1715_v2 = vpop.xlane.xlu0 %1714 }
 0x9fa   :  { %v1719_v60 = vsub.f32 %v1703_v53, %v1715_v2 }
 0x9fc   :  { %v1726_v13 = vmul.f32 1.442695, %v1719_v60 }
 0x9fd   :  { %v3522_v17 = vpop.permute.xlu0 %3521 }
 0x9fe   :  { %3641 = vpow2.f32 %v1726_v13  ;;  %v3524_v15 = vunpack.i.h.bf16 %v3522_v17  ;;  %v3523_v21 = vunpack.i.l.bf16 %v3522_v17 }
 0x9ff   :  { %v3638_v16 = vpop.eup %3637  ;;  %3643 = vpow2.f32 %v1724_v5 }
 0xa00   :  { %v3418_v18 = vpack.c.bf16 %v3524_v15, %v3523_v21  ;;  %v1731_v19 = vsel %vm848_vm2, %v3638_v16, 0.0  ;;  %v3640_v20 = vpop.eup %3639 }
 0xa01   :  { %1732 = vadd.xlane.f32.xlu1 %v1731_v19  ;;  %v1728_v23 = vsel %vm848_vm2, %v3640_v20, 0.0  ;;  %v3532_v31 = vpop.permute.xlu0 %3531 }
 0xa02   :  { %3420 = vmatprep.subr.msk.bf16.mxu0 %vm4427_vm3, %v3418_v18  ;;  %v3533_v37 = vunpack.i.l.bf16 %v3532_v31 }
 0xa03   :  { %3423 = vmatpush3.bf16.xpose.msk.msra.mxu0 %vm4427_vm3, %v3418_v18 }
 0xa05   :  { %1729 = vadd.xlane.f32.xlu1 %v1728_v23  ;;  %v1944_v58 = vpop.permute.xlu0 %1943 }
 0xa08   :  { %v3642_v24 = vpop.eup %3641 }
 0xa09   :  { %v1737_v25 = vsel %vm848_vm2, %v3642_v24, 0.0  ;;  %v3644_v26 = vpop.eup %3643  ;;  %v1946_v47 = vpop.permute.xlu0 %1945 }
 0xa0a   :  { %1738 = vadd.xlane.f32.xlu1 %v1737_v25  ;;  %3271 = vmatmul.mubr.msk.f32.vlgmr.msra.gmra.mrb[12].mxu0 %vm848_vm2, %v4381_v22  ;;  %v1734_v27 = vsel %vm848_vm2, %v3644_v26, 0.0 }
 0xa0b   :  { %3273 = vmatprep.mubr.msk.f32.mxu0 %vm848_vm2, %v4410_v50 }
 0xa0d   :  { %v1950_v49 = vpop.permute.xlu0 %1949 }
 0xa0e   :  { %1735 = vadd.xlane.f32.xlu1 %v1734_v27  ;;  %3274 = vmatmul.mubr.msk.f32.gmra.mrb[14].mxu0 %vm848_vm2, %v4416_v52  ;;  %v3534_v52 = vunpack.i.h.bf16 %v3532_v31 }
 0xa10   :  { %v3448_v43 = vpack.c.bf16 %v3534_v52, %v3533_v37 }
 0xa1f   :  { %3526 = vrot.lane.b32.xlu1 %v4327_v9, %s3995_s28 }
 0xa23   :  { %1947 = vrot.lane.b32.xlu1 %v4493_v36, %s3991_s9 }
 0xa8e   :  { %v1733_v28 = vpop.xlane.xlu1 %1732 }
 0xa92   :  { %v1730_v29 = vpop.xlane.xlu1 %1729 }
 0xa93   :  { %3645 = vrcp.f32 %v1730_v29 }
 0xa94   :  { %3647 = vrcp.f32 %v1733_v28 }
 0xa97   :  { %v1739_v22 = vpop.xlane.xlu1 %1738 }
 0xa9b   :  { %v1736_v30 = vpop.xlane.xlu1 %1735 }
 0xa9c   :  { %3649 = vrcp.f32 %v1736_v30 }
 0xa9d   :  { %v3646_v50 = vpop.eup %3645  ;;  %3651 = vrcp.f32 %v1739_v22 }
 0xa9e   :  { %v1744_v32 = vmul.f32 %v3646_v50, %v3640_v20  ;;  %v3648_v36 = vpop.eup %3647 }
 0xa9f   :  { %v3527_v33 = vpop.permute.xlu1 %3526  ;;  %v1745_v62 = vmul.f32 %v3648_v36, %v3638_v16 }
 0xaa0   :  { %v3529_v38 = vunpack.i.h.bf16 %v3527_v33  ;;  %v3528_v42 = vunpack.i.l.bf16 %v3527_v33  ;;  %3344 = vmatprep.mubr.msk.f32.mxu1 %vm848_vm2, %v1744_v32 }
 0xaa2   :  { %v3444_v6 = vpack.c.bf16 %v3529_v38, %v3528_v42 }
 0xaa3   :  { %v1948_v48 = vpop.permute.xlu1 %1947 }
 0xaa4   :  { %3445 = vmatprep.subr.bf16.mxu1 %v3444_v6 }
 0xaa5   :  { %3447 = vmatpush3.bf16.msra.mxu1 %v3444_v6 }
 0xaa6   :  { %v3650_v44 = vpop.eup %3649  ;;  %3450 = vmatprep.subr.msk.bf16.mxu1 %vm4427_vm3, %v3448_v43 }
 0xaa7   :  { %v3652_v39 = vpop.eup %3651  ;;  %v1746_v45 = vmul.f32 %v3650_v44, %v3644_v26 }
 0xaa8   :  { %3345 = vmatmul.mubr.msk.f32.vlgmr.msra.gmra.mrb[20].mxu1 %vm848_vm2, %v1745_v62  ;;  %v1747_v46 = vmul.f32 %v3652_v39, %v3642_v24 }
 0xaa9   :  { %3347 = vmatprep.mubr.msk.f32.mxu1 %vm848_vm2, %v1746_v45 }
 0xaac   :  { %3348 = vmatmul.mubr.msk.f32.gmra.mrb[22].mxu1 %vm848_vm2, %v1747_v46 }
 0xaad   :  { %3366 = vmatprep.mubr.msk.f32.mxu1 %vm848_vm2, %v1944_v58 }
 0xaae   :  { %3453 = vmatpush3.bf16.xpose.msk.msra.mxu1 %vm4427_vm3, %v3448_v43 }
 0xab5   :  { %3367 = vmatmul.mubr.msk.f32.vlgmr.msra.gmra.mrb[24].mxu1 %vm848_vm2, %v1946_v47 }
 0xab6   :  { %3369 = vmatprep.mubr.msk.f32.mxu1 %vm848_vm2, %v1948_v48 }
 0xab9   :  { %3370 = vmatmul.mubr.msk.f32.gmra.mrb[26].mxu1 %vm848_vm2, %v1950_v49 }
 0xadd   :  { %v3272_v12 = vpop.f32.mrb[12].mxu0 }
 0xade   :  { %v947_v7 = vmul.f32 0.25, %v3272_v12  ;;  %v927_v10 = vpop.f32.mrb[13].mxu0 }
 0xadf   :  { %v946_v53 = vmul.f32 0.25, %v927_v10 }
 0xae0   :  { %v957_v54 = vadd.f32 %v4447_v14, %v947_v7 }
 0xae1   :  { %v3275_v55 = vpop.f32.mrb[14].mxu0  ;;  %v956_v56 = vadd.f32 %v4447_v14, %v946_v53 }
 0xae2   :  { %v937_v59 = vpop.f32.mrb[15].mxu0  ;;  %v963_v61 = vsel %vm848_vm2, %v957_v54, -inf  ;;  %v949_v0 = vmul.f32 0.25, %v3275_v55 }
 0xae3   :  { %v948_v35 = vmul.f32 0.25, %v937_v59  ;;  %964 = vmax.xlane.f32.xlu0 %v963_v61  ;;  %v960_v34 = vsel %vm848_vm2, %v956_v56, -inf }
 0xae4   :  { %961 = vmax.xlane.f32.xlu1 %v960_v34  ;;  %v959_v2 = vadd.f32 %v4447_v14, %v949_v0 }
 0xae5   :  { %v958_v1 = vadd.f32 %v4447_v14, %v948_v35 }
 0xae6   :  { %v969_v60 = vsel %vm848_vm2, %v959_v2, -inf }
 0xae7   :  { %v966_v51 = vsel %vm848_vm2, %v958_v1, -inf }
 0xae8   :  { %967 = vmax.xlane.f32.xlu0 %v966_v51 }
 0xaec   :  { %970 = vmax.xlane.f32.xlu0 %v969_v60 }
 0xb70   :  { %v965_v17 = vpop.xlane.xlu0 %964 }
 0xb71   :  { %v962_v5 = vpop.xlane.xlu1 %961  ;;  %v973_v24 = vsub.f32 %v957_v54, %v965_v17 }
 0xb72   :  { %v972_v13 = vsub.f32 %v956_v56, %v962_v5 }
 0xb73   :  { %v978_v22 = vmul.f32 1.442695, %v973_v24 }
 0xb74   :  { %v976_v15 = vmul.f32 1.442695, %v972_v13 }
 0xb75   :  { %v968_v21 = vpop.xlane.xlu0 %967 }
 0xb76   :  { %3653 = vpow2.f32 %v976_v15  ;;  %v974_v19 = vsub.f32 %v958_v1, %v968_v21 }
 0xb78   :  { %v980_v26 = vmul.f32 1.442695, %v974_v19 }
 0xb79   :  { %v971_v27 = vpop.xlane.xlu0 %970 }
 0xb7a   :  { %v975_v30 = vsub.f32 %v959_v2, %v971_v27  ;;  %3655 = vpow2.f32 %v980_v26 }
 0xb7b   :  { %v4575_v16 = vpop.f32.mrb[20].mxu1  ;;  %3657 = vpow2.f32 %v978_v22 }
 0xb7c   :  { %v4577_v18 = vpop.f32.mrb[21].mxu1  ;;  %v982_v50 = vmul.f32 1.442695, %v975_v30 }
 0xb7d   :  { %v1853_v20 = vpack.c.bf16 %v4575_v16, %v4577_v18 }
 0xb7e   :  { %3659 = vpow2.f32 %v982_v50 }
 0xb7f   :  { %v4581_v23 = vpop.f32.mrb[22].mxu1 }
 0xb80   :  { %v3654_v14 = vpop.eup %3653  ;;  %v4583_v25 = vpop.f32.mrb[23].mxu1 }
 0xb81   :  { %v1854_v28 = vpack.c.bf16 %v4581_v23, %v4583_v25  ;;  %v984_v29 = vsel %vm848_vm2, %v3654_v14, 0.0 }
 0xb82   :  { %985 = vadd.xlane.f32.xlu1 %v984_v29 }
 0xb84   :  { %v4592_v39 = vpop.eup %3655 }
 0xb85   :  { %v3658_v58 = vpop.eup %3657  ;;  %v990_v47 = vsel %vm848_vm2, %v4592_v39, 0.0 }
 0xb86   :  { %v987_v49 = vsel %vm848_vm2, %v3658_v58, 0.0 }
 0xb88   :  { %v3368_v31 = vpop.f32.mrb[24].mxu1  ;;  %v3660_v12 = vpop.eup %3659 }
 0xb89   :  { %v2053_v32 = vmul.f32 0.25, %v3368_v31  ;;  %v2033_v33 = vpop.f32.mrb[25].mxu1  ;;  %v993_v10 = vsel %vm848_vm2, %v3660_v12, 0.0 }
 0xb8a   :  { %v2052_v52 = vmul.f32 0.25, %v2033_v33 }
 0xb8b   :  { %v2057_v37 = vadd.f32 %v2053_v32, %v4518_v57 }
 0xb8c   :  { %v3371_v38 = vpop.f32.mrb[26].mxu1  ;;  %v2056_v42 = vadd.f32 %v2052_v52, %v4518_v57 }
 0xb8d   :  { %v2055_v6 = vmul.f32 0.25, %v3371_v38  ;;  %v2043_v36 = vpop.f32.mrb[27].mxu1  ;;  %v2063_v43 = vsel %vm848_vm2, %v2057_v37, -inf }
 0xb8e   :  { %v2054_v44 = vmul.f32 0.25, %v2043_v36  ;;  %2064 = vmax.xlane.f32.xlu0 %v2063_v43  ;;  %v2060_v62 = vsel %vm848_vm2, %v2056_v42, -inf }
 0xb8f   :  { %2061 = vmax.xlane.f32.xlu1 %v2060_v62  ;;  %v2059_v45 = vadd.f32 %v2055_v6, %v4518_v57  ;;  %v3996_v62 = vmov 0.0  }
 0xb90   :  { %v2058_v48 = vadd.f32 %v2054_v44, %v4518_v57  ;;  %v3553_v44 = vld [vmem:[#allocation14 + $0x8] sm:$0xff]  }
 0xb91   :  { %v2069_v46 = vsel %vm848_vm2, %v2059_v45, -inf }
 0xb92   :  { %2070 = vmax.xlane.f32.xlu0 %v2069_v46  ;;  %v2066_v7 = vsel %vm848_vm2, %v2058_v48, -inf }
 0xb93   :  { %991 = vadd.xlane.f32.xlu1 %v990_v47 }
 0xb96   :  { %988 = vadd.xlane.f32.xlu0 %v987_v49 }
 0xb97   :  { %2067 = vmax.xlane.f32.xlu1 %v2066_v7 }
 0xb9a   :  { %994 = vadd.xlane.f32.xlu0 %v993_v10 }
 0xba8   :  { %3536 = vrot.lane.b32.xlu1 %v4335_v11, %s3995_s28 }
 0xbac   :  { %3541 = vrot.lane.b32.xlu1 %v4327_v9, %s3994_s8 }
 0xc0f   :  { %v986_v53 = vpop.xlane.xlu1 %985 }
 0xc10   :  { %3661 = vrcp.f32 %v986_v53 }
 0xc1a   :  { %v3662_v57 = vpop.eup %3661 }
 0xc1b   :  { %v2065_v54 = vpop.xlane.xlu0 %2064  ;;  %v1000_v55 = vmul.f32 %v3662_v57, %v3654_v14 }
 0xc1c   :  { %v2073_v56 = vsub.f32 %v2057_v37, %v2065_v54  ;;  %v2062_v59 = vpop.xlane.xlu1 %2061 }
 0xc1d   :  { %v2072_v61 = vsub.f32 %v2056_v42, %v2062_v59  ;;  %3280 = vmatprep.mubr.msk.f32.mxu0 %vm848_vm2, %v1000_v55 }
 0xc1e   :  { %v2078_v0 = vmul.f32 1.442695, %v2073_v56 }
 0xc1f   :  { %v2076_v35 = vmul.f32 1.442695, %v2072_v61  ;;  %v2071_v34 = vpop.xlane.xlu0 %2070 }
 0xc20   :  { %v992_v1 = vpop.xlane.xlu1 %991  ;;  %v2075_v11 = vsub.f32 %v2059_v45, %v2071_v34  ;;  %v3555_v34 = vld [vmem:[#allocation14 + $0x10] sm:$0xff]  }
 0xc21   :  { %3663 = vpow2.f32 %v2076_v35 }
 0xc22   :  { %3665 = vpow2.f32 %v2078_v0  ;;  %v2082_v60 = vmul.f32 1.442695, %v2075_v11  ;;  %v3554_v0 = vld [vmem:[#allocation14] sm:$0xff]  }
 0xc23   :  { %v989_v51 = vpop.xlane.xlu0 %988  ;;  %3667 = vrcp.f32 %v992_v1  ;;  %v3556_v1 = vld [vmem:[#allocation14 + $0x18] sm:$0xff]  }
 0xc24   :  { %v2068_v9 = vpop.xlane.xlu1 %2067  ;;  %3669 = vrcp.f32 %v989_v51 }
 0xc25   :  { %v2074_v2 = vsub.f32 %v2058_v48, %v2068_v9 }
 0xc27   :  { %v2080_v5 = vmul.f32 1.442695, %v2074_v2  ;;  %v995_v13 = vpop.xlane.xlu0 %994 }
 0xc28   :  { %3671 = vrcp.f32 %v995_v13  ;;  %v3537_v17 = vpop.permute.xlu1 %3536 }
 0xc29   :  { %3673 = vpow2.f32 %v2080_v5  ;;  %v3539_v15 = vunpack.i.h.bf16 %v3537_v17  ;;  %v3538_v21 = vunpack.i.l.bf16 %v3537_v17 }
 0xc2a   :  { %3675 = vpow2.f32 %v2082_v60 }
 0xc2b   :  { %v3664_v19 = vpop.eup %3663  ;;  %v3424_v14 = vpack.c.bf16 %v3539_v15, %v3538_v21 }
 0xc2c   :  { %v3542_v24 = vpop.permute.xlu1 %3541  ;;  %v2084_v26 = vsel %vm848_vm2, %v3664_v19, 0.0  ;;  %v3666_v27 = vpop.eup %3665 }
 0xc2d   :  { %v3544_v29 = vunpack.i.h.bf16 %v3542_v24  ;;  %v3543_v22 = vunpack.i.l.bf16 %v3542_v24  ;;  %3425 = vmatprep.subr.bf16.mxu0 %v3424_v14  ;;  %2085 = vadd.xlane.f32.xlu0 %v2084_v26  ;;  %v3668_v30 = vpop.eup %3667  ;;  %v2087_v33 = vsel %vm848_vm2, %v3666_v27, 0.0 }
 0xc2e   :  { %3427 = vmatpush3.bf16.msra.mxu0 %v3424_v14  ;;  %v3670_v50 = vpop.eup %3669  ;;  %v1002_v52 = vmul.f32 %v3668_v30, %v4592_v39  ;;  %v4678_v30 = vld [vmem:[%s4876_s15] ss:$0 sm:$0xff] }
 0xc2f   :  { %v3454_v31 = vpack.c.bf16 %v3544_v29, %v3543_v22  ;;  %v1001_v32 = vmul.f32 %v3670_v50, %v3658_v58  ;;  %3286 = vmatprep.subr.bf16.mxu0 %v3996_v62 }
 0xc31   :  { %3455 = vmatprep.subr.bf16.mxu1 %v3454_v31  ;;  %2088 = vadd.xlane.f32.xlu0 %v2087_v33 }
 0xc32   :  { %v3672_v37 = vpop.eup %3671  ;;  %3281 = vmatmul.mubr.msk.f32.vlgmr.msra.gmra.mrb[16].mxu0 %vm848_vm2, %v1001_v32  ;;  %3457 = vmatpush3.bf16.msra.mxu1 %v3454_v31  ;;  %v2301_v32 = vld [vmem:[#allocation8] sm:$0xff] }
 0xc33   :  { %v3674_v38 = vpop.eup %3673  ;;  %3283 = vmatprep.mubr.msk.f32.mxu0 %vm848_vm2, %v1002_v52  ;;  %v1003_v42 = vmul.f32 %v3672_v37, %v3660_v12  ;;  %3287 = vmatpush3.bf16.msra.mxu0 %v3553_v44  ;;  %v2302_v37 = vld [vmem:[#allocation8 + $0x8] sm:$0xff] }
 0xc34   :  { %v2090_v6 = vsel %vm848_vm2, %v3674_v38, 0.0  ;;  %v3676_v36 = vpop.eup %3675  ;;  %3292 = vmatprep.subr.bf16.mxu0 %v3996_v62 }
 0xc35   :  { %2091 = vadd.xlane.f32.xlu0 %v2090_v6  ;;  %v2093_v43 = vsel %vm848_vm2, %v3676_v36, 0.0  ;;  %v3741_v6 = vld [vmem:[%s4901_s6] sm:$0xff] }
 0xc36   :  { %3284 = vmatmul.mubr.msk.f32.gmra.mrb[18].mxu0 %vm848_vm2, %v1003_v42 }
 0xc37   :  { %3288 = vmatprep.mubr.msk.bf16.mxu0 %vm3997_vm6, %v3996_v62 }
 0xc39   :  { %2094 = vadd.xlane.f32.xlu0 %v2093_v43 }
 0xcba   :  { %v2086_v39 = vpop.xlane.xlu0 %2085 }
 0xcbb   :  { %3677 = vrcp.f32 %v2086_v39 }
 0xcbe   :  { %v2089_v45 = vpop.xlane.xlu0 %2088 }
 0xcbf   :  { %3679 = vrcp.f32 %v2089_v45 }
 0xcc2   :  { %v2092_v46 = vpop.xlane.xlu0 %2091 }
 0xcc3   :  { %3681 = vrcp.f32 %v2092_v46 }
 0xcc5   :  { %v3678_v58 = vpop.eup %3677 }
 0xcc6   :  { %v2095_v47 = vpop.xlane.xlu0 %2094  ;;  %v2100_v48 = vmul.f32 %v3678_v58, %v3664_v19 }
 0xcc7   :  { %3683 = vrcp.f32 %v2095_v47  ;;  %v3559_v47 = vld [vmem:[%s4871_s10 + $0x4] ss:$16 sps:$4 sm:$0xff]  }
 0xcc8   :  { %3376 = vmatprep.mubr.msk.f32.mxu1 %vm848_vm2, %v2100_v48  ;;  %v3562_v48 = vld [vmem:[%s4871_s10 + $0xc] ss:$16 sps:$4 sm:$0xff]   ;;  %2515 = vmatprep.subr.bf16.mxu1 %v3559_v47  ;;  %v3582_v47 = vld [vmem:[%s4872_s11] sm:$0xff]  }
 0xcc9   :  { %v3680_v49 = vpop.eup %3679 }
 0xcca   :  { %v2101_v12 = vmul.f32 %v3680_v49, %v3666_v27  ;;  %v3557_v49 = vld [vmem:[%s4871_s10] ss:$16 sps:$4 sm:$0xff]  }
 0xccc   :  { %3377 = vmatmul.mubr.msk.f32.vlgmr.msra.gmra.mrb[28].mxu1 %vm848_vm2, %v2101_v12  ;;  %v3560_v12 = vld [vmem:[%s4871_s10 + $0x8] ss:$16 sps:$4 sm:$0xff]  }
 0xccd   :  { %v3682_v7 = vpop.eup %3681  ;;  %2516 = vmatpush1.bf16.msra.mxu1 %v3557_v49  ;;  %v3584_v49 = vld [vmem:[%s4872_s11 + $0x8] sm:$0xff]  }
 0xcce   :  { %v2102_v10 = vmul.f32 %v3682_v7, %v3674_v38  ;;  %v3565_v7 = vld [vmem:[%s4871_s10 + $0x24] ss:$16 sps:$4 sm:$0xff]  }
 0xccf   :  { %2517 = vmatprep.subr.bf16.mxu1 %v3565_v7  ;;  %v3586_v7 = vld [vmem:[%s4872_s11 + $0x10] sm:$0xff]  }
 0xcd0   :  { %3379 = vmatprep.mubr.msk.f32.mxu1 %vm848_vm2, %v2102_v10  ;;  %v3568_v10 = vld [vmem:[%s4871_s10 + $0x2c] ss:$16 sps:$4 sm:$0xff]  }
 0xcd1   :  { %v3684_v53 = vpop.eup %3683 }
 0xcd2   :  { %v2103_v57 = vmul.f32 %v3684_v53, %v3676_v36  ;;  %v3563_v53 = vld [vmem:[%s4871_s10 + $0x20] ss:$16 sps:$4 sm:$0xff]  }
 0xcd3   :  { %2518 = vmatpush1.bf16.msra.mxu1 %v3563_v53  ;;  %v3587_v53 = vld [vmem:[%s4872_s11 + $0x58] sm:$0xff]  }
 0xcd4   :  { %3380 = vmatmul.mubr.msk.f32.gmra.mrb[30].mxu1 %vm848_vm2, %v2103_v57  ;;  %v3566_v57 = vld [vmem:[%s4871_s10 + $0x28] ss:$16 sps:$4 sm:$0xff]  }
 0xd05   :  { %v3282_v54 = vpop.f32.mrb[16].mxu0 }
 0xd06   :  { %v1090_v55 = vpop.f32.mrb[17].mxu0 }
 0xd07   :  { %v1109_v56 = vpack.c.bf16 %v3282_v54, %v1090_v55  ;;  %v3571_v54 = vld [vmem:[%s4871_s10 + $0x44] ss:$16 sps:$4 sm:$0xff]   ;;  %v3574_v55 = vld [vmem:[%s4871_s10 + $0x4c] ss:$16 sps:$4 sm:$0xff]  }
 0xd08   :  { %2519 = vmatprep.subr.bf16.mxu1 %v3571_v54  ;;  %v3588_v54 = vld [vmem:[%s4872_s11 + $0x18] sm:$0xff]  }
 0xd09   :  { %v3285_v59 = vpop.f32.mrb[18].mxu0 }
 0xd0a   :  { %v1100_v61 = vpop.f32.mrb[19].mxu0 }
 0xd0b   :  { %v1110_v35 = vpack.c.bf16 %v3285_v59, %v1100_v61  ;;  %v3572_v59 = vld [vmem:[%s4871_s10 + $0x48] ss:$16 sps:$4 sm:$0xff]   ;;  %v3577_v61 = vld [vmem:[%s4871_s10 + $0x64] ss:$16 sps:$4 sm:$0xff]  }
 0xd0d   :  { %3289 = vmatmul.mubr.msk.bf16.vlgmr.msra.gmra.mrb[20].mxu0 %vm848_vm2, %v1110_v35  ;;  %v3575_v35 = vld [vmem:[%s4871_s10 + $0x60] ss:$16 sps:$4 sm:$0xff]  }
 0xd0e   :  { %3293 = vmatpush3.bf16.msra.mxu0 %v3554_v0  ;;  %3294 = vmatprep.mubr.msk.bf16.mxu0 %vm3997_vm6, %v3996_v62 }
 0xd0f   :  { %3318 = vmatprep.subr.bf16.mxu0 %v3996_v62 }
 0xd19   :  { %3295 = vmatmul.mubr.msk.bf16.vlgmr.msra.gmra.mrb[20].mxu0 %vm848_vm2, %v1109_v56  ;;  %v3569_v56 = vld [vmem:[%s4871_s10 + $0x40] ss:$16 sps:$4 sm:$0xff]  }
 0xd1a   :  { %3319 = vmatpush3.bf16.msra.mxu0 %v3555_v34  ;;  %3320 = vmatprep.mubr.msk.bf16.mxu0 %vm3997_vm6, %v3996_v62 }
 0xd1b   :  { %3324 = vmatprep.subr.bf16.mxu0 %v3996_v62  ;;  %2520 = vmatpush1.bf16.msra.mxu1 %v3569_v56 }
 0xd1c   :  { %2521 = vmatprep.subr.bf16.mxu1 %v3577_v61 }
 0xd1f   :  { %2522 = vmatpush1.bf16.msra.mxu1 %v3575_v35 }
 0xd25   :  { %3321 = vmatmul.mubr.msk.bf16.vlgmr.msra.gmra.mrb[20].mxu0 %vm848_vm2, %v1475_v8 }
 0xd26   :  { %3325 = vmatpush3.bf16.msra.mxu0 %v3556_v1  ;;  %3326 = vmatprep.mubr.msk.bf16.mxu0 %vm3997_vm6, %v3996_v62 }
 0xd27   :  { %3350 = vmatprep.subr.bf16.mxu0 %v3996_v62 }
 0xd31   :  { %3327 = vmatmul.mubr.msk.bf16.vlgmr.msra.gmra.mrb[20].mxu0 %vm848_vm2, %v1528_v63 }
 0xd32   :  { %3351 = vmatpush3.bf16.msra.mxu0 %v3553_v44  ;;  %3352 = vmatprep.mubr.msk.bf16.mxu0 %vm3997_vm6, %v3996_v62 }
 0xd33   :  { %3356 = vmatprep.subr.bf16.mxu0 %v3996_v62 }
 0xd39   :  { %3353 = vmatmul.mubr.msk.bf16.vlgmr.msra.gmra.mrb[24].mxu0 %vm848_vm2, %v1854_v28 }
 0xd3a   :  { %3357 = vmatpush3.bf16.msra.mxu0 %v3554_v0  ;;  %3358 = vmatprep.mubr.msk.bf16.mxu0 %vm3997_vm6, %v3996_v62  ;;  %v3580_v0 = vld [vmem:[%s4871_s10 + $0x6c] ss:$16 sps:$4 sm:$0xff]  }
 0xd3b   :  { %3382 = vmatprep.subr.bf16.mxu0 %v3996_v62 }
 0xd45   :  { %3359 = vmatmul.mubr.msk.bf16.vlgmr.msra.gmra.mrb[24].mxu0 %vm848_vm2, %v1853_v20 }
 0xd46   :  { %3383 = vmatpush3.bf16.msra.mxu0 %v3555_v34  ;;  %3384 = vmatprep.mubr.msk.bf16.mxu0 %vm3997_vm6, %v3996_v62  ;;  %v3578_v34 = vld [vmem:[%s4871_s10 + $0x68] ss:$16 sps:$4 sm:$0xff]  }
 0xd47   :  { %3388 = vmatprep.subr.bf16.mxu0 %v3996_v62 }
 0xd9f   :  { %v3378_v3 = vpop.f32.mrb[28].mxu1 }
 0xda0   :  { %v2188_v4 = vpop.f32.mrb[29].mxu1 }
 0xda1   :  { %v2207_v8 = vpack.c.bf16 %v3378_v3, %v2188_v4 }
 0xda3   :  { %3385 = vmatmul.mubr.msk.bf16.vlgmr.msra.gmra.mrb[24].mxu0 %vm848_vm2, %v2207_v8 }
 0xda4   :  { %3389 = vmatpush3.bf16.msra.mxu0 %v3556_v1  ;;  %3390 = vmatprep.mubr.msk.bf16.mxu0 %vm3997_vm6, %v3996_v62  ;;  %v3742_v62 = vld [vmem:[%s4901_s6 + $0x8] sm:$0xff]  ;;  %v3998_v1 = vmov 0  }
 0xda5   :  { %2568 = vmatprep.subr.bf16.mxu0 %v3562_v48  ;;  %2547 = vmatprep.mubr.bf16.mxu1 %v3998_v1  ;;  %v3583_v48 = vld [vmem:[%s4872_s11 + $0x48] sm:$0xff]  }
 0xda7   :  { %v3381_v40 = vpop.f32.mrb[30].mxu1 }
 0xda8   :  { %v2198_v41 = vpop.f32.mrb[31].mxu1 }
 0xda9   :  { %v2254_v63 = vpack.c.bf16 %v3381_v40, %v2198_v41 }
 0xdaf   :  { %3391 = vmatmul.mubr.msk.bf16.vlgmr.msra.gmra.mrb[24].mxu0 %vm848_vm2, %v2254_v63 }
 0xdb0   :  { %2569 = vmatpush1.bf16.msra.mxu0 %v3560_v12  ;;  %2600 = vmatprep.mubr.bf16.mxu0 %v3998_v1  ;;  %v3585_v12 = vld [vmem:[%s4872_s11 + $0x50] sm:$0xff]  }
 0xdb1   :  { %2570 = vmatprep.subr.bf16.mxu0 %v3568_v10 }
 0xdb4   :  { %2571 = vmatpush1.bf16.msra.mxu0 %v3566_v57 }
 0xdb5   :  { %2572 = vmatprep.subr.bf16.mxu0 %v3574_v55 }
 0xdb8   :  { %2573 = vmatpush1.bf16.msra.mxu0 %v3572_v59  ;;  %v3589_v59 = vld [vmem:[%s4872_s11 + $0x60] sm:$0xff]  }
 0xdb9   :  { %2574 = vmatprep.subr.bf16.mxu0 %v3580_v0  ;;  %v3590_v0 = vld [vmem:[%s4872_s11 + $0x20] sm:$0xff]  }
 0xdbc   :  { %2575 = vmatpush1.bf16.msra.mxu0 %v3578_v34  ;;  %v3591_v34 = vld [vmem:[%s4872_s11 + $0x68] sm:$0xff]  }
 0xe04   :  { %v1572_v16 = vpop.f32.mrb[20].mxu0 }
 0xe05   :  { %v2306_v18 = vmul.f32 %v1572_v16, %v1572_v16  ;;  %v3328_v20 = vpop.f32.mrb[21].mxu0 }
 0xe06   :  { %v1575_v23 = vpop.f32.mrb[22].mxu0  ;;  %v2303_v20 = vld [vmem:[#allocation8 + $0x10] sm:$0xff] }
 0xe07   :  { %v2307_v25 = vmul.f32 %v1575_v23, %v1575_v23  ;;  %v3329_v28 = vpop.f32.mrb[23].mxu0  ;;  %v2310_v11 = vsel %vm198_vm0, %v2306_v18, 0.0 }
 0xe08   :  { %2311 = vadd.xlane.f32.xlu0 %v2310_v11 }
 0xe09   :  { %v2313_v51 = vsel %vm198_vm0, %v2307_v25, 0.0 }
 0xe0a   :  { %2314 = vadd.xlane.f32.xlu1 %v2313_v51  ;;  %v2304_v51 = vld [vmem:[#allocation8 + $0x18] sm:$0xff] }
 0xe82   :  { %v4665_v9 = vpop.f32.mrb[24].mxu0 }
 0xe83   :  { %v2308_v2 = vmul.f32 %v4665_v9, %v4665_v9  ;;  %v3392_v60 = vpop.f32.mrb[25].mxu0 }
 0xe84   :  { %v4669_v5 = vpop.f32.mrb[26].mxu0 }
 0xe85   :  { %v2309_v13 = vmul.f32 %v4669_v5, %v4669_v5  ;;  %v3393_v17 = vpop.f32.mrb[27].mxu0  ;;  %v2316_v15 = vsel %vm198_vm0, %v2308_v2, 0.0  ;;  %v3743_v2 = vld [vmem:[%s4901_s6 + $0x10] sm:$0xff] }
 0xe86   :  { %2317 = vadd.xlane.f32.xlu0 %v2316_v15 }
 0xe87   :  { %v2319_v21 = vsel %vm198_vm0, %v2309_v13, 0.0 }
 0xe8a   :  { %2320 = vadd.xlane.f32.xlu0 %v2319_v21 }
 0xe95   :  { %v2312_v19 = vpop.xlane.xlu0 %2311 }
 0xe96   :  { %v2322_v14 = vmul.f32 0.015625, %v2312_v19 }
 0xe97   :  { %v2315_v24 = vpop.xlane.xlu1 %2314 }
 0xe98   :  { %v2326_v26 = vadd.f32 1e-05, %v2322_v14  ;;  %v2323_v27 = vmul.f32 0.015625, %v2315_v24 }
 0xe9a   :  { %3685 = vrsqrt.f32 %v2326_v26  ;;  %v2327_v29 = vadd.f32 1e-05, %v2323_v27 }
 0xe9c   :  { %3687 = vrsqrt.f32 %v2327_v29 }
 0xea4   :  { %v3686_v22 = vpop.eup %3685 }
 0xea5   :  { %v2334_v50 = vmul.f32 %v3686_v22, %v1572_v16 }
 0xea6   :  { %v3688_v31 = vpop.eup %3687 }
 0xea7   :  { %v2335_v33 = vmul.f32 %v3688_v31, %v1575_v23  ;;  %v2344_v52 = vmul.f32 %v4678_v30, %v2334_v50 }
 0xea9   :  { %v2348_v38 = vmul.f32 %v2344_v52, %v2301_v32  ;;  %v2345_v42 = vmul.f32 %v4678_v30, %v2335_v33  ;;  %v4770_v32 = vld [vmem:[%s4877_s16] ss:$0 sm:$0xff]  ;;  %v2400_v52 = vld [vmem:[#allocation10 + $0x8] sm:$0xff] }
 0xeaa   :  { %v2399_v33 = vld [vmem:[#allocation10] sm:$0xff] }
 0xeab   :  { %v4685_v36 = vadd.f32 %v3741_v6, %v2348_v38  ;;  %v2349_v43 = vmul.f32 %v2345_v42, %v2302_v37  ;;  %v2403_v38 = vadd.f32 1.0, %v2399_v33  ;;  %v2404_v6 = vadd.f32 1.0, %v2400_v52 }
 0xead   :  { %v2357_v44 = vmul.f32 %v4685_v36, %v4685_v36  ;;  %v4692_v39 = vadd.f32 %v3742_v62, %v2349_v43 }
 0xeaf   :  { %v2361_v45 = vsel %vm198_vm0, %v2357_v44, 0.0  ;;  %v2358_v46 = vmul.f32 %v4692_v39, %v4692_v39 }
 0xeb0   :  { %2362 = vadd.xlane.f32.xlu0 %v2361_v45 }
 0xeb1   :  { %v2364_v58 = vsel %vm198_vm0, %v2358_v46, 0.0 }
 0xeb4   :  { %2365 = vadd.xlane.f32.xlu0 %v2364_v58  ;;  %v3581_v58 = vld [vmem:[%s4872_s11 + $0x40] sm:$0xff]  }
 0xeb5   :  { %3170 = vmatprep.subr.bf16.mxu1 %v3581_v58 }
 0xf13   :  { %v2318_v3 = vpop.xlane.xlu0 %2317 }
 0xf14   :  { %v2324_v4 = vmul.f32 0.015625, %v2318_v3  ;;  %v3593_v3 = vld [vmem:[%s4872_s11 + $0x70] sm:$0xff]  }
 0xf16   :  { %v2328_v8 = vadd.f32 1e-05, %v2324_v4  ;;  %v3594_v4 = vld [vmem:[%s4872_s11 + $0x30] sm:$0xff]  }
 0xf17   :  { %v2321_v40 = vpop.xlane.xlu0 %2320 }
 0xf18   :  { %3689 = vrsqrt.f32 %v2328_v8  ;;  %v2325_v41 = vmul.f32 0.015625, %v2321_v40 }
 0xf1a   :  { %v2329_v63 = vadd.f32 1e-05, %v2325_v41  ;;  %v3595_v41 = vld [vmem:[%s4872_s11 + $0x78] sm:$0xff]  }
 0xf1c   :  { %3691 = vrsqrt.f32 %v2329_v63  ;;  %v2401_v63 = vld [vmem:[#allocation10 + $0x10] sm:$0xff] }
 0xf22   :  { %v3690_v16 = vpop.eup %3689 }
 0xf23   :  { %v2336_v18 = vmul.f32 %v3690_v16, %v4665_v9  ;;  %v2402_v16 = vld [vmem:[#allocation10 + $0x18] sm:$0xff] }
 0xf25   :  { %v2346_v23 = vmul.f32 %v4678_v30, %v2336_v18  ;;  %v3596_v18 = vld [vmem:[%s4872_s11 + $0x38] sm:$0xff]  }
 0xf26   :  { %v3692_v25 = vpop.eup %3691 }
 0xf27   :  { %v2337_v28 = vmul.f32 %v3692_v25, %v4669_v5  ;;  %v2350_v11 = vmul.f32 %v2346_v23, %v2303_v20  ;;  %v3744_v5 = vld [vmem:[%s4901_s6 + $0x18] sm:$0xff] }
 0xf29   :  { %v4752_v60 = vadd.f32 %v3743_v2, %v2350_v11  ;;  %v2347_v13 = vmul.f32 %v4678_v30, %v2337_v28  ;;  %v2405_v28 = vadd.f32 1.0, %v2401_v63  ;;  %v2406_v11 = vadd.f32 1.0, %v2402_v16 }
 0xf2b   :  { %v2359_v17 = vmul.f32 %v4752_v60, %v4752_v60  ;;  %v2351_v9 = vmul.f32 %v2347_v13, %v2304_v51 }
 0xf2d   :  { %v2367_v15 = vsel %vm198_vm0, %v2359_v17, 0.0  ;;  %v4761_v21 = vadd.f32 %v3744_v5, %v2351_v9 }
 0xf2e   :  { %2368 = vadd.xlane.f32.xlu0 %v2367_v15 }
 0xf2f   :  { %v2360_v19 = vmul.f32 %v4761_v21, %v4761_v21 }
 0xf31   :  { %v2370_v14 = vsel %vm198_vm0, %v2360_v19, 0.0 }
 0xf32   :  { %2371 = vadd.xlane.f32.xlu0 %v2370_v14 }
 0xf3d   :  { %v2363_v24 = vpop.xlane.xlu0 %2362 }
 0xf3e   :  { %v2373_v26 = vmul.f32 0.015625, %v2363_v24 }
 0xf40   :  { %v2377_v27 = vadd.f32 1e-05, %v2373_v26 }
 0xf41   :  { %v2366_v29 = vpop.xlane.xlu0 %2365 }
 0xf42   :  { %3693 = vrsqrt.f32 %v2377_v27  ;;  %v2374_v22 = vmul.f32 0.015625, %v2366_v29 }
 0xf44   :  { %v2378_v30 = vadd.f32 1e-05, %v2374_v22 }
 0xf46   :  { %3695 = vrsqrt.f32 %v2378_v30 }
 0xf4c   :  { %v3694_v50 = vpop.eup %3693 }
 0xf4d   :  { %v2385_v31 = vmul.f32 %v3694_v50, %v4685_v36 }
 0xf4f   :  { %v2395_v42 = vmul.f32 %v4770_v32, %v2385_v31 }
 0xf50   :  { %v3696_v37 = vpop.eup %3695 }
 0xf51   :  { %v2386_v43 = vmul.f32 %v3696_v37, %v4692_v39  ;;  %v2407_v62 = vmul.f32 %v2403_v38, %v2395_v42 }
 0xf53   :  { %v2396_v44 = vmul.f32 %v4770_v32, %v2386_v43 }
 0xf55   :  { %v2408_v45 = vmul.f32 %v2404_v6, %v2396_v44 }
 0xf57   :  { %v2427_v46 = vpack.c.bf16 %v2408_v45, %v2407_v62 }
 0xf59   :  { %3041 = vmatmul.mubr.msk.bf16.vlgmr.msra.gmra.mrb[32].mxu1 %vm198_vm0, %v2427_v46  ;;  %3043 = vmatmul.mubr.msk.bf16.vlgmr.msra.gmra.mrb[28].mxu0 %vm198_vm0, %v2427_v46 }
 0xf5a   :  { %2557 = vmatprep.mubr.bf16.mxu1 %v3998_v1  ;;  %2610 = vmatprep.mubr.bf16.mxu0 %v3998_v1  ;;  %v3592_v1 = vld [vmem:[%s4872_s11 + $0x28] sm:$0xff]  }
 0xf5b   :  { %3171 = vmatpush3.bf16.msra.mxu1 %v3582_v47 }
 0xf5c   :  { %3172 = vmatprep.subr.bf16.mxu1 %v3583_v48 }
 0xf5f   :  { %3173 = vmatpush3.bf16.msra.mxu1 %v3584_v49 }
 0xf60   :  { %3174 = vmatprep.subr.bf16.mxu1 %v3585_v12 }
 0xf63   :  { %3175 = vmatpush3.bf16.msra.mxu1 %v3586_v7 }
 0xf64   :  { %3176 = vmatprep.subr.bf16.mxu1 %v3587_v53 }
 0xf67   :  { %3177 = vmatpush3.bf16.msra.mxu1 %v3588_v54 }
 0xf68   :  { %3178 = vmatprep.subr.bf16.mxu1 %v3589_v59 }
 0xf6b   :  { %3179 = vmatpush3.bf16.msra.mxu1 %v3590_v0 }
 0xf6c   :  { %3180 = vmatprep.subr.bf16.mxu1 %v3591_v34 }
 0xf6f   :  { %3181 = vmatpush3.bf16.msra.mxu1 %v3592_v1 }
 0xf70   :  { %3182 = vmatprep.subr.bf16.mxu1 %v3593_v3 }
 0xf73   :  { %3183 = vmatpush3.bf16.msra.mxu1 %v3594_v4 }
 0xf74   :  { %3184 = vmatprep.subr.bf16.mxu1 %v3595_v41 }
 0xf77   :  { %3185 = vmatpush3.bf16.msra.mxu1 %v3596_v18 }
 0xfbb   :  { %v2369_v10 = vpop.xlane.xlu0 %2368 }
 0xfbc   :  { %v2375_v57 = vmul.f32 0.015625, %v2369_v10 }
 0xfbe   :  { %v2379_v55 = vadd.f32 1e-05, %v2375_v57 }
 0xfbf   :  { %v2372_v56 = vpop.xlane.xlu0 %2371 }
 0xfc0   :  { %3697 = vrsqrt.f32 %v2379_v55  ;;  %v2376_v61 = vmul.f32 0.015625, %v2372_v56 }
 0xfc2   :  { %v2380_v35 = vadd.f32 1e-05, %v2376_v61 }
 0xfc4   :  { %3699 = vrsqrt.f32 %v2380_v35 }
 0xfca   :  { %v3698_v8 = vpop.eup %3697 }
 0xfcb   :  { %v2387_v40 = vmul.f32 %v3698_v8, %v4752_v60 }
 0xfcd   :  { %v2397_v25 = vmul.f32 %v4770_v32, %v2387_v40 }
 0xfce   :  { %v3700_v20 = vpop.eup %3699 }
 0xfcf   :  { %v2388_v23 = vmul.f32 %v3700_v20, %v4761_v21  ;;  %v2409_v2 = vmul.f32 %v2405_v28, %v2397_v25 }
 0xfd1   :  { %v2398_v51 = vmul.f32 %v4770_v32, %v2388_v23 }
 0xfd3   :  { %v2410_v13 = vmul.f32 %v2406_v11, %v2398_v51 }
 0xfd5   :  { %v2428_v17 = vpack.c.bf16 %v2410_v13, %v2409_v2 }
 0xfd7   :  { %3042 = vmatmul.mubr.msk.bf16.gmra.mrb[36].mxu1 %vm198_vm0, %v2428_v17  ;;  %3044 = vmatmul.mubr.msk.bf16.gmra.mrb[32].mxu0 %vm198_vm0, %v2428_v17 }
0x102c   :  { %v2549_v9 = vpop.f32.mrb[32].mxu1  ;;  %v2602_v15 = vpop.f32.mrb[28].mxu0 }
0x102d   :  { %v3045_v5 = vmul.f32 -1.442695, %v2549_v9  ;;  %v2551_v19 = vpop.f32.mrb[33].mxu1  ;;  %v2604_v14 = vpop.f32.mrb[29].mxu0 }
0x102e   :  { %v3046_v24 = vmul.f32 -1.442695, %v2551_v19  ;;  %v2553_v26 = vpop.f32.mrb[34].mxu1  ;;  %v2606_v27 = vpop.f32.mrb[30].mxu0 }
0x102f   :  { %3701 = vpow2.f32 %v3045_v5  ;;  %v3047_v29 = vmul.f32 -1.442695, %v2553_v26  ;;  %v2555_v22 = vpop.f32.mrb[35].mxu1  ;;  %v2608_v30 = vpop.f32.mrb[31].mxu0 }
0x1030   :  { %3703 = vpow2.f32 %v3046_v24  ;;  %v3048_v50 = vmul.f32 -1.442695, %v2555_v22 }
0x1031   :  { %3705 = vpow2.f32 %v3047_v29 }
0x1032   :  { %3707 = vpow2.f32 %v3048_v50 }
0x1039   :  { %v3702_v31 = vpop.eup %3701 }
0x103a   :  { %v3704_v32 = vpop.eup %3703  ;;  %v2645_v33 = vadd.f32 1.0, %v3702_v31 }
0x103b   :  { %v3706_v52 = vpop.eup %3705  ;;  %v2646_v37 = vadd.f32 1.0, %v3704_v32 }
0x103c   :  { %v3708_v38 = vpop.eup %3707  ;;  %3709 = vrcp.f32 %v2645_v33  ;;  %v2647_v42 = vadd.f32 1.0, %v3706_v52 }
0x103d   :  { %3711 = vrcp.f32 %v2646_v37  ;;  %v2648_v6 = vadd.f32 1.0, %v3708_v38 }
0x103e   :  { %3713 = vrcp.f32 %v2647_v42 }
0x103f   :  { %3715 = vrcp.f32 %v2648_v6 }
0x1046   :  { %v3710_v43 = vpop.eup %3709 }
0x1047   :  { %v3712_v44 = vpop.eup %3711  ;;  %v2669_v62 = vmul.f32 %v3710_v43, %v2549_v9 }
0x1048   :  { %v3714_v45 = vpop.eup %3713  ;;  %v2670_v46 = vmul.f32 %v3712_v44, %v2551_v19 }
0x1049   :  { %v3716_v58 = vpop.eup %3715  ;;  %v2677_v47 = vmul.f32 %v2669_v62, %v2602_v15  ;;  %v2671_v48 = vmul.f32 %v3714_v45, %v2553_v26 }
0x104a   :  { %v2678_v49 = vmul.f32 %v2670_v46, %v2604_v14  ;;  %v2672_v12 = vmul.f32 %v3716_v58, %v2555_v22 }
0x104b   :  { %v2679_v7 = vmul.f32 %v2671_v48, %v2606_v27 }
0x104c   :  { %v2680_v10 = vmul.f32 %v2672_v12, %v2608_v30 }
0x104d   :  { %v2717_v53 = vpack.c.bf16 %v2679_v7, %v2677_v47 }
0x104e   :  { %v2718_v57 = vpack.c.bf16 %v2680_v10, %v2678_v49 }
0x1050   :  { %2849 = vmatprep.mubr.bf16.mxu1 %v2718_v57 }
0x1051   :  { %2850 = vmatmul.mubr.bf16.vlgmr.msra.gmra.mrb[40].mxu1 %v2717_v53 }
0x10aa   :  { %v2559_v54 = vpop.f32.mrb[36].mxu1  ;;  %v2612_v55 = vpop.f32.mrb[32].mxu0 }
0x10ab   :  { %v3049_v56 = vmul.f32 -1.442695, %v2559_v54  ;;  %v2561_v59 = vpop.f32.mrb[37].mxu1  ;;  %v2614_v61 = vpop.f32.mrb[33].mxu0 }
0x10ac   :  { %v3050_v0 = vmul.f32 -1.442695, %v2561_v59  ;;  %v2563_v35 = vpop.f32.mrb[38].mxu1  ;;  %v2616_v34 = vpop.f32.mrb[34].mxu0 }
0x10ad   :  { %3717 = vpow2.f32 %v3049_v56  ;;  %v3051_v1 = vmul.f32 -1.442695, %v2563_v35  ;;  %v2565_v3 = vpop.f32.mrb[39].mxu1  ;;  %v2618_v4 = vpop.f32.mrb[35].mxu0 }
0x10ae   :  { %3719 = vpow2.f32 %v3050_v0  ;;  %v3052_v8 = vmul.f32 -1.442695, %v2565_v3 }
0x10af   :  { %3721 = vpow2.f32 %v3051_v1  ;;  %v2867_v1 = vld [vmem:[#allocation11 + $0x8] sm:$0xff] }
0x10b0   :  { %3723 = vpow2.f32 %v3052_v8 }
0x10b7   :  { %v3718_v40 = vpop.eup %3717 }
0x10b8   :  { %v3720_v41 = vpop.eup %3719  ;;  %v2649_v63 = vadd.f32 1.0, %v3718_v40 }
0x10b9   :  { %v3722_v16 = vpop.eup %3721  ;;  %v2650_v18 = vadd.f32 1.0, %v3720_v41 }
0x10ba   :  { %v3724_v20 = vpop.eup %3723  ;;  %3725 = vrcp.f32 %v2649_v63  ;;  %v2651_v23 = vadd.f32 1.0, %v3722_v16 }
0x10bb   :  { %3727 = vrcp.f32 %v2650_v18  ;;  %v2652_v25 = vadd.f32 1.0, %v3724_v20 }
0x10bc   :  { %3729 = vrcp.f32 %v2651_v23 }
0x10bd   :  { %3731 = vrcp.f32 %v2652_v25 }
0x10c4   :  { %v3726_v28 = vpop.eup %3725 }
0x10c5   :  { %v3728_v11 = vpop.eup %3727  ;;  %v2673_v51 = vmul.f32 %v3726_v28, %v2559_v54 }
0x10c6   :  { %v3730_v2 = vpop.eup %3729  ;;  %v2674_v13 = vmul.f32 %v3728_v11, %v2561_v59  ;;  %v2866_v59 = vld [vmem:[#allocation11] sm:$0xff] }
0x10c7   :  { %v3732_v17 = vpop.eup %3731  ;;  %v2681_v9 = vmul.f32 %v2673_v51, %v2612_v55  ;;  %v2675_v15 = vmul.f32 %v3730_v2, %v2563_v35  ;;  %v3069_v55 = vld [vmem:[%s4878_s17] ss:$0 sm:$0xff]  ;;  %v2868_v51 = vld [vmem:[#allocation11 + $0x10] sm:$0xff]  ;;  %s3999_s17 = smov [#allocation17]  }
0x10c8   :  { %v2682_v5 = vmul.f32 %v2674_v13, %v2614_v61  ;;  %v2676_v19 = vmul.f32 %v3732_v17, %v2565_v3  ;;  %v2869_v13 = vld [vmem:[#allocation11 + $0x18] sm:$0xff]  ;;  %s2930_s22 = sshll.u32 %s3999_s17, 4  ;;  %s2931_s22 = int_to_ptr.vmem [resolvable:$true] %s2930_s22 }
0x10c9   :  { %v2683_v14 = vmul.f32 %v2675_v15, %v2616_v34  ;;  %s3943_s13 = scalar_lea.vmem %s2931_s22, 512  ;;  %p3948_p3 = scmp.lt.s32.totalorder %s2931_s22, %s2931_s22 }
0x10ca   :  { %v2684_v24 = vmul.f32 %v2676_v19, %v2618_v4  ;;  %p3944_p2 = scmp.ne.s32.totalorder %s2931_s22, %s3943_s13  ;;  %p3949_p4 = scmp.lt.s32.totalorder %s3943_s13, %s3943_s13 }
0x10cb   :  { %v2719_v26 = vpack.c.bf16 %v2683_v14, %v2681_v9 }
0x10cc   :  { %v2720_v27 = vpack.c.bf16 %v2684_v24, %v2682_v5  ;;  %p3950_p5 = por %p3949_p4, %p3948_p3 }
0x10ce   :  { %2857 = vmatprep.mubr.bf16.mxu1 %v2720_v27  ;;  %p3951_p6 = pnand %p3950_p5, %p3944_p2 }
0x10cf   :  { %2858 = vmatmul.mubr.bf16.gmra.mrb[44].mxu1 %v2719_v26 }
0x1124   :  { %v3186_v29 = vpop.f32.mrb[40].mxu1 }
0x1125   :  { %v3187_v22 = vpop.f32.mrb[41].mxu1 }
0x1126   :  { %v3188_v30 = vadd.f32 %v3187_v22, %v3186_v29  ;;  %v3189_v50 = vpop.f32.mrb[42].mxu1 }
0x1127   :  { %v3190_v31 = vpop.f32.mrb[43].mxu1 }
0x1128   :  { %v3191_v32 = vadd.f32 %v3190_v31, %v3189_v50  ;;  %v2871_v33 = vmul.f32 %v3188_v30, %v3188_v30 }
0x112a   :  { %v2875_v52 = vsel %vm198_vm0, %v2871_v33, 0.0  ;;  %v2872_v37 = vmul.f32 %v3191_v32, %v3191_v32 }
0x112b   :  { %2876 = vadd.xlane.f32.xlu0 %v2875_v52 }
0x112c   :  { %v2878_v38 = vsel %vm198_vm0, %v2872_v37, 0.0 }
0x112f   :  { %2879 = vadd.xlane.f32.xlu0 %v2878_v38 }
0x11a2   :  { %v3192_v42 = vpop.f32.mrb[44].mxu1 }
0x11a3   :  { %v3193_v6 = vpop.f32.mrb[45].mxu1 }
0x11a4   :  { %v3194_v43 = vadd.f32 %v3193_v6, %v3192_v42  ;;  %v3195_v44 = vpop.f32.mrb[46].mxu1 }
0x11a5   :  { %v3196_v62 = vpop.f32.mrb[47].mxu1 }
0x11a6   :  { %v3197_v45 = vadd.f32 %v3196_v62, %v3195_v44  ;;  %v2873_v46 = vmul.f32 %v3194_v43, %v3194_v43 }
0x11a8   :  { %v2881_v58 = vsel %vm198_vm0, %v2873_v46, 0.0  ;;  %v2874_v47 = vmul.f32 %v3197_v45, %v3197_v45 }
0x11a9   :  { %2882 = vadd.xlane.f32.xlu0 %v2881_v58 }
0x11aa   :  { %v2884_v48 = vsel %vm198_vm0, %v2874_v47, 0.0 }
0x11ab   :  { %2885 = vadd.xlane.f32.xlu1 %v2884_v48 }
0x11b8   :  { %v2877_v49 = vpop.xlane.xlu0 %2876 }
0x11b9   :  { %v2887_v12 = vmul.f32 0.015625, %v2877_v49 }
0x11bb   :  { %v2891_v7 = vadd.f32 1e-05, %v2887_v12 }
0x11bc   :  { %v2880_v10 = vpop.xlane.xlu0 %2879 }
0x11bd   :  { %3733 = vrsqrt.f32 %v2891_v7  ;;  %v2888_v53 = vmul.f32 0.015625, %v2880_v10 }
0x11bf   :  { %v2892_v57 = vadd.f32 1e-05, %v2888_v53 }
0x11c1   :  { %3735 = vrsqrt.f32 %v2892_v57 }
0x11c7   :  { %v3734_v54 = vpop.eup %3733 }
0x11c8   :  { %v2899_v56 = vmul.f32 %v3734_v54, %v3188_v30 }
0x11ca   :  { %v2909_v61 = vmul.f32 %v3069_v55, %v2899_v56 }
0x11cb   :  { %v3736_v0 = vpop.eup %3735 }
0x11cc   :  { %v2900_v35 = vmul.f32 %v3736_v0, %v3191_v32  ;;  %v2913_v34 = vmul.f32 %v2909_v61, %v2866_v59 }
0x11ce   :  { %v2910_v3 = vmul.f32 %v3069_v55, %v2900_v35  ;;  %v2917_v4 = vadd.f32 %v2913_v34, %v4685_v36 }
0x11d0   :  { %v2914_v8 = vmul.f32 %v2910_v3, %v2867_v1  ;;  %2921 = vst.msk [vmem:[#allocation17] sm:$0xff] %vm198_vm0, %v2917_v4 }
0x11d2   :  { %v2918_v40 = vadd.f32 %v2914_v8, %v4692_v39 }
0x11d4   :  { %2922 = vst.msk [vmem:[#allocation17 + $0x8] sm:$0xff] %vm198_vm0, %v2918_v40 }
0x1236   :  { %v2883_v41 = vpop.xlane.xlu0 %2882 }
0x1237   :  { %v2889_v63 = vmul.f32 0.015625, %v2883_v41 }
0x1238   :  { %v2886_v16 = vpop.xlane.xlu1 %2885 }
0x1239   :  { %v2893_v18 = vadd.f32 1e-05, %v2889_v63  ;;  %v2890_v20 = vmul.f32 0.015625, %v2886_v16 }
0x123b   :  { %3737 = vrsqrt.f32 %v2893_v18  ;;  %v2894_v23 = vadd.f32 1e-05, %v2890_v20 }
0x123d   :  { %3739 = vrsqrt.f32 %v2894_v23 }
0x1245   :  { %v3738_v25 = vpop.eup %3737 }
0x1246   :  { %v2901_v28 = vmul.f32 %v3738_v25, %v3194_v43 }
0x1247   :  { %v3740_v11 = vpop.eup %3739 }
0x1248   :  { %v2911_v36 = vmul.f32 %v3069_v55, %v2901_v28  ;;  %v2902_v2 = vmul.f32 %v3740_v11, %v3197_v45 }
0x124a   :  { %v2912_v17 = vmul.f32 %v3069_v55, %v2902_v2  ;;  %v2915_v9 = vmul.f32 %v2911_v36, %v2868_v51 }
0x124c   :  { %v2916_v39 = vmul.f32 %v2912_v17, %v2869_v13  ;;  %v2919_v15 = vadd.f32 %v2915_v9, %v4752_v60 }
0x124e   :  { %v2920_v5 = vadd.f32 %v2916_v39, %v4761_v21  ;;  %2923 = vst.msk [vmem:[#allocation17 + $0x10] sm:$0xff] %vm198_vm0, %v2919_v15 }
0x1250   :  { %2924 = vst.msk [vmem:[#allocation17 + $0x18] sm:$0xff] %vm198_vm0, %v2920_v5 }
0x1251   :  { %3954 = shalt.err (!%p3951_p6)
}
0x1252   :  { %s3955_s26 = scalar_lea.hbm %s4881_s20, 512 }
0x1253   :  { %p3956_p7 = scmp.ne.s32.totalorder %s4881_s20, %s3955_s26  ;;  %p3959_p8 = scmp.lt.u32.totalorder %s3955_s26, %s4881_s20 }
0x1255   :  { %p3961_p9 = pnand %p3959_p8, %p3956_p7 }
0x1257   :  { %3964 = shalt.err (!%p3961_p9)
}
0x1258   :  { %2936 = dma.vmem_to_hbm [thread:$0]  %s2931_s22, 512, %s4881_s20, [#allocation4], %s3979_s0, %s3979_s0, %s3980_s21  }
0x1259   :  { %3975 = dma.done.wait [#allocation4], 512  }
0x125a   :  { %3976 = vsyncadd [#allocation4], 4294966784 }
0x125b   :  { %2940 = vsyncpa [#allocation3], 1 }
0x125c   :  { %2941 = vsyncpa [#allocation6], 1 }
0x125d   :  { %2942 = vsyncpa [#allocation9], 1 }
0x125e   :  { %2943 = vsyncpa [#allocation12], 1 }
0x125f   :  { %2944 = vsyncpa [#allocation15], 1 }
0x1260   :  { %2945 = vsyncpa [#allocation4], 1 }

</bundles_post_ra>
